<compile_context>
chip_gen: v5e
topology: v5e:2x2
jax: 0.10.0
libtpu: 0.0.40
codegen_flags: <defaults>
</compile_context>

<pallas_src>
import numpy as np
import jax
import jax.numpy as jnp
from jax.experimental import pallas as pl
from jax.experimental.pallas import tpu as pltpu


# ---------------------------------------------------------------------------
# Host-side helpers (run once at parameter-prep time, not per call)
# ---------------------------------------------------------------------------
def bilinear_matrix(n_in: int, n_out: int) -> np.ndarray:
    """Interpolation matrix of torch Upsample(mode='bilinear', align_corners=True)."""
    W = np.zeros((n_out, n_in), np.float32)
    if n_in == 1 or n_out == 1:
        W[:, 0] = 1.0
        return W
    scale = (n_in - 1) / (n_out - 1)
    for o in range(n_out):
        s = o * scale
        i0 = min(int(np.floor(s)), n_in - 1)
        i1 = min(i0 + 1, n_in - 1)
        f = s - i0
        W[o, i0] += 1.0 - f
        W[o, i1] += f
    return W


def init_params(key, in_channels: int, out_channels: int):
    """Deterministic synthetic parameters mirroring the nn.Module shapes."""
    ks = jax.random.split(key, 8)
    wd_raw = 0.1 * jax.random.normal(ks[0], (in_channels, 1, 3, 3), jnp.float32)
    bd = 0.1 * jax.random.normal(ks[1], (in_channels,), jnp.float32)
    wp_raw = 0.1 * jax.random.normal(ks[2], (out_channels, in_channels, 1, 1), jnp.float32)
    bp = 0.1 * jax.random.normal(ks[3], (out_channels,), jnp.float32)
    gamma = 1.0 + 0.1 * jax.random.normal(ks[4], (out_channels,), jnp.float32)
    beta = 0.1 * jax.random.normal(ks[5], (out_channels,), jnp.float32)
    mean = 0.1 * jax.random.normal(ks[6], (out_channels,), jnp.float32)
    var = jnp.abs(jax.random.normal(ks[7], (out_channels,), jnp.float32)) + 0.5
    return dict(wd_raw=wd_raw, bd=bd, wp_raw=wp_raw, bp=bp,
                gamma=gamma, beta=beta, mean=mean, var=var)


def prepare_consts(params, x1_shape, x2_shape, eps: float = 1e-5):
    """Fold upsample/pad/halo into interpolation matrices and dw-bias+BN into the
    pointwise conv.  Hoisted out of the forward pass (computed once)."""
    _, C1, H1, W1 = x1_shape
    _, C2, Ht, Wt = x2_shape
    Hu, Wu = 2 * H1, 2 * W1
    diff_y, diff_x = Ht - Hu, Wt - Wu
    assert diff_y >= 0 and diff_x >= 0, \
        "x2 spatial size must be >= 2 * x1 spatial size (F.pad would crop otherwise)"
    pad_t, pad_l = diff_y // 2, diff_x // 2

    wy = bilinear_matrix(H1, Hu)                       # (Hu, H1)
    wx = bilinear_matrix(W1, Wu)                       # (Wu, W1)

    # Row matrix: rows 0..Ht+1 of the 3x3-conv-haloed, F.padded, upsampled map.
    wyh = np.zeros((Ht + 2, H1), np.float32)
    wyh[1 + pad_t: 1 + pad_t + Hu, :] = wy
    # Column matrix: cols 0..Wt+1 of the same map.
    wxh = np.zeros((W1, Wt + 2), np.float32)
    wxh[:, 1 + pad_l: 1 + pad_l + Wu] = wx.T

    Cin = C1 + C2
    wd2 = np.asarray(params["wd_raw"], np.float32).reshape(Cin, 9)        # (Cin, 9)
    wp2 = np.asarray(params["wp_raw"], np.float32).reshape(-1, Cin)       # (Cout, Cin)
    bd = np.asarray(params["bd"], np.float32)
    bp = np.asarray(params["bp"], np.float32)
    gamma = np.asarray(params["gamma"], np.float32)
    beta = np.asarray(params["beta"], np.float32)
    mean = np.asarray(params["mean"], np.float32)
    var = np.asarray(params["var"], np.float32)

    scale = gamma / np.sqrt(var + eps)
    wp_eff = (wp2 * scale[:, None]).astype(np.float32)                    # (Cout, Cin)
    b_eff = (scale * (wp2 @ bd + bp - mean) + beta).astype(np.float32)    # (Cout,)

    return dict(wyh=jnp.asarray(wyh), wxh=jnp.asarray(wxh),
                wd=jnp.asarray(wd2), wp_eff=jnp.asarray(wp_eff),
                b_eff=jnp.asarray(b_eff).reshape(-1, 1))


# ---------------------------------------------------------------------------
# Fused Up kernel: one (batch, row-tile) grid step = one NCHW output tile
# ---------------------------------------------------------------------------
def _up_dconv_kernel(x1_ref, x2_ref, x2t_ref, x2b_ref,
                     wyh_ref, wxh_ref, wd_ref, wp_ref, be_ref, o_ref):
    f32 = jnp.float32
    t = pl.program_id(1)
    n_t = pl.num_programs(1)

    _, C1, H1, W1 = x1_ref.shape
    _, C2, th, Wt = x2_ref.shape
    Cin = C1 + C2
    Cout = o_ref.shape[1]

    # ---- x1 path: bilinear 2x upsample + F.pad + conv halo (all folded in wxh/wyh) ----
    x1 = x1_ref[0].astype(f32)                                            # (C1, H1, W1)
    x1w = jnp.einsum("chw,wj->chj", x1, wxh_ref[...].astype(f32),
                     preferred_element_type=f32)                          # (C1, H1, Wt+2)
    r0 = pl.multiple_of(t * th, 8)
    wy_t = wyh_ref[pl.ds(r0, th + 2), :].astype(f32)                      # (th+2, H1)
    x1h = jnp.einsum("rh,chj->crj", wy_t, x1w,
                     preferred_element_type=f32)                          # (C1, th+2, Wt+2)

    # ---- x2 path: haloed row tile (C2, th+2, Wt+2); zeros at image borders ----
    x2m = x2_ref[0].astype(f32)                                           # (C2, th, Wt)
    top = x2t_ref[0][:, 7, :].astype(f32) * (t > 0).astype(f32)           # row above tile
    bot = x2b_ref[0][:, 0, :].astype(f32) * (t < n_t - 1).astype(f32)     # row below tile
    rows = jnp.concatenate([top[:, None, :], x2m, bot[:, None, :]], axis=1)  # (C2, th+2, Wt)
    zc = jnp.zeros((C2, th + 2, 1), f32)
    x2h = jnp.concatenate([zc, rows, zc], axis=2)                         # (C2, th+2, Wt+2)

    # ---- torch.cat([x2, x1_up], dim=1) ----
    xh = jnp.concatenate([x2h, x1h], axis=0)                              # (Cin, th+2, Wt+2)

    # ---- depthwise 3x3 (VPU); its bias is folded into the pointwise epilogue ----
    wd = wd_ref[...].astype(f32)                                          # (Cin, 9)
    acc = jnp.zeros((Cin, th, Wt), f32)
    for dy in range(3):
        for dx in range(3):
            k = dy * 3 + dx
            acc = acc + xh[:, dy:dy + th, dx:dx + Wt] * wd[:, k].reshape(Cin, 1, 1)

    # ---- pointwise 1x1 (MXU) + folded (dw-bias + pw-bias + BN) + ReLU ----
    y = jnp.dot(wp_ref[...].astype(f32), acc.reshape(Cin, th * Wt),
                preferred_element_type=f32)                               # (Cout, th*Wt)
    y = jnp.maximum(y + be_ref[...].astype(f32), 0.0)
    o_ref[...] = y.reshape(1, Cout, th, Wt).astype(o_ref.dtype)


def _pick_tile_h(Ht, Wt, Cin, Cout, budget_bytes=8 * 1024 * 1024):
    """Largest row-tile height (multiple of 8, divides Ht) fitting a VMEM budget."""
    best = 8
    for cand in range(8, Ht + 1, 8):
        if Ht % cand:
            continue
        work = 4 * (3 * Cin * (cand + 2) * (Wt + 2)     # haloed input + slices
                    + Cin * cand * Wt                   # depthwise accumulator
                    + 3 * Cout * cand * Wt)             # output tile (double buffered)
        if work <= budget_bytes:
            best = cand
    return best


def up_forward(x1, x2, consts, *, tile_h=None):
    """Up.forward: x1 (B,C1,H1,W1) low-res feature, x2 (B,C2,Ht,Wt) skip connection."""
    B, C1, H1, W1 = x1.shape
    _, C2, Ht, Wt = x2.shape
    Cin = C1 + C2
    Cout = consts["wp_eff"].shape[0]
    assert Ht % 8 == 0, "height must be a multiple of 8 for this row tiling"
    if tile_h is None:
        tile_h = _pick_tile_h(Ht, Wt, Cin, Cout)
    assert Ht % tile_h == 0 and tile_h % 8 == 0
    T = Ht // tile_h
    thb = tile_h // 8          # tile height in 8-row blocks
    Hb = Ht // 8               # x2 height in 8-row blocks

    in_specs = [
        # whole low-res x1 per batch (small; stays resident across the row tiles)
        pl.BlockSpec((1, C1, H1, W1), lambda b, t: (b, 0, 0, 0)),
        # main x2 row tile
        pl.BlockSpec((1, C2, tile_h, Wt), lambda b, t: (b, 0, t, 0)),
        # 8-row blocks holding the halo row just above / below the tile
        pl.BlockSpec((1, C2, 8, Wt),
                     lambda b, t: (b, 0, jnp.maximum(t * thb - 1, 0), 0)),
        pl.BlockSpec((1, C2, 8, Wt),
                     lambda b, t: (b, 0, jnp.minimum(t * thb + thb, Hb - 1), 0)),
        # small constants, resident in VMEM
        pl.BlockSpec((Ht + 2, H1), lambda b, t: (0, 0)),
        pl.BlockSpec((W1, Wt + 2), lambda b, t: (0, 0)),
        pl.BlockSpec((Cin, 9), lambda b, t: (0, 0)),
        pl.BlockSpec((Cout, Cin), lambda b, t: (0, 0)),
        pl.BlockSpec((Cout, 1), lambda b, t: (0, 0)),
    ]
    out_specs = pl.BlockSpec((1, Cout, tile_h, Wt), lambda b, t: (b, 0, t, 0))

    flops = int(2 * B * Ht * Wt * Cin * Cout                       # pointwise 1x1
                + 2 * 9 * B * Ht * Wt * Cin                        # depthwise 3x3
                + 2 * B * T * C1 * H1 * (Wt + 2) * W1              # width interp
                + 2 * B * T * C1 * (tile_h + 2) * (Wt + 2) * H1)   # row interp
    bytes_accessed = int(4 * (x1.size + x2.size + B * Cout * Ht * Wt))

    return pl.pallas_call(
        _up_dconv_kernel,
        out_shape=jax.ShapeDtypeStruct((B, Cout, Ht, Wt), jnp.float32),
        grid=(B, T),
        in_specs=in_specs,
        out_specs=out_specs,
        compiler_params=pltpu.CompilerParams(
            dimension_semantics=("parallel", "parallel"),  # megacore-friendly on v7x
            vmem_limit_bytes=48 * 1024 * 1024,             # safe on v7x's 64 MiB VMEM
        ),
        cost_estimate=pl.CostEstimate(flops=flops, transcendentals=0,
                                      bytes_accessed=bytes_accessed),
    )(x1, x2, x2, x2,
      consts["wyh"], consts["wxh"], consts["wd"], consts["wp_eff"], consts["b_eff"])


# ---------------------------------------------------------------------------
# Pure-JAX reference (same math, XLA ops) for correctness check
# ---------------------------------------------------------------------------
def ref_forward(p, x1, x2):
    B, C1, H1, W1 = x1.shape
    Hu, Wu = 2 * H1, 2 * W1
    wy = jnp.asarray(bilinear_matrix(H1, Hu))
    wx = jnp.asarray(bilinear_matrix(W1, Wu))
    x1_up = jnp.einsum("oh,bchw,pw->bcop", wy, x1, wx)
    diff_y = x2.shape[2] - Hu
    diff_x = x2.shape[3] - Wu
    x1_up = jnp.pad(x1_up, ((0, 0), (0, 0),
                            (diff_y // 2, diff_y - diff_y // 2),
                            (diff_x // 2, diff_x - diff_x // 2)))
    x = jnp.concatenate([x2, x1_up], axis=1)
    Cin = x.shape[1]
    y = jax.lax.conv_general_dilated(
        x, p["wd_raw"], (1, 1), ((1, 1), (1, 1)),
        feature_group_count=Cin,
        dimension_numbers=("NCHW", "OIHW", "NCHW"),
        precision=jax.lax.Precision.HIGHEST)
    y = y + p["bd"][None, :, None, None]
    y = jax.lax.conv_general_dilated(
        y, p["wp_raw"], (1, 1), ((0, 0), (0, 0)),
        dimension_numbers=("NCHW", "OIHW", "NCHW"),
        precision=jax.lax.Precision.HIGHEST)
    y = y + p["bp"][None, :, None, None]
    eps = 1e-5
    scale = p["gamma"] / jnp.sqrt(p["var"] + eps)
    shift = p["beta"] - p["mean"] * scale
    y = y * scale[None, :, None, None] + shift[None, :, None, None]
    return jnp.maximum(y, 0.0)


if __name__ == "__main__":
    key = jax.random.PRNGKey(0)
    kx1, kx2, kp = jax.random.split(key, 3)

    # x1: low-res decoder feature (NCHW), x2: skip connection (NCHW)
    B, C1, H1, W1 = 2, 4, 8, 8
    C2, Ht, Wt = 4, 16, 16
    in_channels = C1 + C2        # channels seen by DConv after concat
    out_channels = 4

    x1 = jax.random.normal(kx1, (B, C1, H1, W1), jnp.float32)
    x2 = jax.random.normal(kx2, (B, C2, Ht, Wt), jnp.float32)
    params = init_params(kp, in_channels, out_channels)
    consts = prepare_consts(params, x1.shape, x2.shape)

    ref = jax.block_until_ready(ref_forward(params, x1, x2))

    # exercise both the multi-row-tile (halo) path and the single-tile path
    for th in (8, 16):
        out = jax.block_until_ready(up_forward(x1, x2, consts, tile_h=th))
        assert out.shape == (B, out_channels, Ht, Wt), out.shape
        np.testing.assert_allclose(np.asarray(out), np.asarray(ref),
                                   rtol=2e-3, atol=2e-3)

    print("KERNEL_OK")
</pallas_src>

<mosaic_0001>
module attributes {stable_mosaic.version = 11 : i64} {
  func.func @_up_dconv_kernel(%arg0: i32, %arg1: i32, %arg2: memref<1x4x8x8xf32, #tpu.memory_space<vmem>>, %arg3: memref<1x4x8x16xf32, #tpu.memory_space<vmem>>, %arg4: memref<1x4x8x16xf32, #tpu.memory_space<vmem>>, %arg5: memref<1x4x8x16xf32, #tpu.memory_space<vmem>>, %arg6: memref<18x8xf32, #tpu.memory_space<vmem>>, %arg7: memref<8x18xf32, #tpu.memory_space<vmem>>, %arg8: memref<8x9xf32, #tpu.memory_space<vmem>>, %arg9: memref<4x8xf32, #tpu.memory_space<vmem>>, %arg10: memref<4x1xf32, #tpu.memory_space<vmem>>, %arg11: memref<1x4x8x16xf32, #tpu.memory_space<vmem>>) attributes {dimension_semantics = [#tpu.dimension_semantics<parallel>, #tpu.dimension_semantics<parallel>], iteration_bounds = array<i64: 2, 2>, scalar_prefetch = 0 : i64, scratch_operands = 0 : i64, tpu.core_type = #tpu.core_type<tc>, window_params = [{transform_indices = @transform_0, window_bounds = array<i64: 1, 4, 8, 8>}, {transform_indices = @transform_1, window_bounds = array<i64: 1, 4, 8, 16>}, {transform_indices = @transform_2, window_bounds = array<i64: 1, 4, 8, 16>}, {transform_indices = @transform_3, window_bounds = array<i64: 1, 4, 8, 16>}, {pipeline_mode = #tpu.pipeline_mode<synchronous>, transform_indices = @transform_4, window_bounds = array<i64: 18, 8>}, {pipeline_mode = #tpu.pipeline_mode<synchronous>, transform_indices = @transform_5, window_bounds = array<i64: 8, 18>}, {pipeline_mode = #tpu.pipeline_mode<synchronous>, transform_indices = @transform_6, window_bounds = array<i64: 8, 9>}, {pipeline_mode = #tpu.pipeline_mode<synchronous>, transform_indices = @transform_7, window_bounds = array<i64: 4, 8>}, {pipeline_mode = #tpu.pipeline_mode<synchronous>, transform_indices = @transform_8, window_bounds = array<i64: 4, 1>}, {transform_indices = @transform_9, window_bounds = array<i64: 1, 4, 8, 16>}]} {
    %c0 = arith.constant 0 : index
    %c0_0 = arith.constant 0 : index
    %c0_1 = arith.constant 0 : index
    %c0_2 = arith.constant 0 : index
    %0 = vector.load %arg2[%c0, %c0_0, %c0_1, %c0_2] : memref<1x4x8x8xf32, #tpu.memory_space<vmem>>, vector<1x4x8x8xf32>
    %1 = vector.shape_cast %0 : vector<1x4x8x8xf32> to vector<4x8x8xf32>
    %c0_3 = arith.constant 0 : index
    %c0_4 = arith.constant 0 : index
    %2 = vector.load %arg7[%c0_3, %c0_4] : memref<8x18xf32, #tpu.memory_space<vmem>>, vector<8x18xf32>
    "tpu.trace_start"() <{level = 10 : i32, message = "chw,wj->chj"}> : () -> ()
    %cst = arith.constant dense<0.000000e+00> : vector<4x8x18xf32>
    %3 = tpu.matmul %1, %2, %cst {dimension_numbers = #tpu.dot_dimension_numbers<[2], [0], [0, 1], [1], [0, 0, 0, 1, 1, 1], [], []>} : vector<4x8x8xf32>, vector<8x18xf32>, vector<4x8x18xf32> -> vector<4x8x18xf32>
    "tpu.trace_stop"() : () -> ()
    %c8_i32 = arith.constant 8 : i32
    %4 = arith.muli %arg1, %c8_i32 : i32
    %5 = tpu.assume_multiple %4, 8 : i32
    %6 = arith.index_cast %5 : i32 to index
    %c0_5 = arith.constant 0 : index
    %7 = vector.load %arg6[%6, %c0_5] : memref<18x8xf32, #tpu.memory_space<vmem>>, vector<10x8xf32>
    "tpu.trace_start"() <{level = 10 : i32, message = "rh,chj->crj"}> : () -> ()
    %cst_6 = arith.constant dense<0.000000e+00> : vector<4x18x10xf32>
    %8 = tpu.matmul %3, %7, %cst_6 {dimension_numbers = #tpu.dot_dimension_numbers<[1], [1], [0, 2], [0], [0, 0, 0, 2, 1, 0], [], []>} : vector<4x8x18xf32>, vector<10x8xf32>, vector<4x18x10xf32> -> vector<4x18x10xf32>
    %9 = tpu.transpose %8, [0, 2, 1] : vector<4x18x10xf32> -> vector<4x10x18xf32>
    "tpu.trace_stop"() : () -> ()
    %c0_7 = arith.constant 0 : index
    %c0_8 = arith.constant 0 : index
    %c0_9 = arith.constant 0 : index
    %c0_10 = arith.constant 0 : index
    %10 = vector.load %arg3[%c0_7, %c0_8, %c0_9, %c0_10] : memref<1x4x8x16xf32, #tpu.memory_space<vmem>>, vector<1x4x8x16xf32>
    %11 = vector.shape_cast %10 : vector<1x4x8x16xf32> to vector<4x8x16xf32>
    %c0_11 = arith.constant 0 : index
    %c0_12 = arith.constant 0 : index
    %c0_13 = arith.constant 0 : index
    %c0_14 = arith.constant 0 : index
    %12 = vector.load %arg4[%c0_11, %c0_12, %c0_13, %c0_14] : memref<1x4x8x16xf32, #tpu.memory_space<vmem>>, vector<1x4x8x16xf32>
    %13 = vector.shape_cast %12 : vector<1x4x8x16xf32> to vector<4x8x16xf32>
    %14 = vector.extract_strided_slice %13 {offsets = [0, 7, 0], sizes = [4, 1, 16], strides = [1, 1, 1]} : vector<4x8x16xf32> to vector<4x1x16xf32>
    %15 = vector.shape_cast %14 : vector<4x1x16xf32> to vector<4x16xf32>
    %c0_i32 = arith.constant 0 : i32
    %16 = arith.cmpi sgt, %arg1, %c0_i32 : i32
    %17 = arith.extui %16 : i1 to i32
    %18 = arith.sitofp %17 : i32 to f32
    %19 = vector.broadcast %18 : f32 to vector<4x16xf32>
    %20 = arith.mulf %15, %19 : vector<4x16xf32>
    %c0_15 = arith.constant 0 : index
    %c0_16 = arith.constant 0 : index
    %c0_17 = arith.constant 0 : index
    %c0_18 = arith.constant 0 : index
    %21 = vector.load %arg5[%c0_15, %c0_16, %c0_17, %c0_18] : memref<1x4x8x16xf32, #tpu.memory_space<vmem>>, vector<1x4x8x16xf32>
    %22 = vector.shape_cast %21 : vector<1x4x8x16xf32> to vector<4x8x16xf32>
    %23 = vector.extract_strided_slice %22 {offsets = [0, 0, 0], sizes = [4, 1, 16], strides = [1, 1, 1]} : vector<4x8x16xf32> to vector<4x1x16xf32>
    %24 = vector.shape_cast %23 : vector<4x1x16xf32> to vector<4x16xf32>
    %c1_i32 = arith.constant 1 : i32
    %25 = arith.cmpi slt, %arg1, %c1_i32 : i32
    %26 = arith.extui %25 : i1 to i32
    %27 = arith.sitofp %26 : i32 to f32
    %28 = vector.broadcast %27 : f32 to vector<4x16xf32>
    %29 = arith.mulf %24, %28 : vector<4x16xf32>
    %30 = vector.shape_cast %20 : vector<4x16xf32> to vector<4x1x16xf32>
    %31 = vector.shape_cast %29 : vector<4x16xf32> to vector<4x1x16xf32>
    %32 = tpu.concatenate %30, %11, %31 in 1 : vector<4x1x16xf32>, vector<4x8x16xf32>, vector<4x1x16xf32> -> vector<4x10x16xf32>
    %cst_19 = arith.constant 0.000000e+00 : f32
    %33 = vector.broadcast %cst_19 : f32 to vector<4x10x1xf32>
    %34 = tpu.concatenate %33, %32, %33 in 2 : vector<4x10x1xf32>, vector<4x10x16xf32>, vector<4x10x1xf32> -> vector<4x10x18xf32>
    %35 = tpu.concatenate %34, %9 in 0 : vector<4x10x18xf32>, vector<4x10x18xf32> -> vector<8x10x18xf32>
    %c0_20 = arith.constant 0 : index
    %c0_21 = arith.constant 0 : index
    %36 = vector.load %arg8[%c0_20, %c0_21] : memref<8x9xf32, #tpu.memory_space<vmem>>, vector<8x9xf32>
    %cst_22 = arith.constant 0.000000e+00 : f32
    %37 = vector.broadcast %cst_22 : f32 to vector<8x8x16xf32>
    %38 = vector.extract_strided_slice %35 {offsets = [0, 0, 0], sizes = [8, 8, 16], strides = [1, 1, 1]} : vector<8x10x18xf32> to vector<8x8x16xf32>
    %39 = vector.extract_strided_slice %36 {offsets = [0, 0], sizes = [8, 1], strides = [1, 1]} : vector<8x9xf32> to vector<8x1xf32>
    %40 = vector.shape_cast %39 : vector<8x1xf32> to vector<8xf32>
    %41 = vector.shape_cast %40 : vector<8xf32> to vector<8x1x1xf32>
    %42 = vector.broadcast %41 : vector<8x1x1xf32> to vector<8x8x16xf32>
    %43 = arith.mulf %38, %42 : vector<8x8x16xf32>
    %44 = arith.addf %37, %43 : vector<8x8x16xf32>
    %45 = vector.extract_strided_slice %35 {offsets = [0, 0, 1], sizes = [8, 8, 16], strides = [1, 1, 1]} : vector<8x10x18xf32> to vector<8x8x16xf32>
    %46 = vector.extract_strided_slice %36 {offsets = [0, 1], sizes = [8, 1], strides = [1, 1]} : vector<8x9xf32> to vector<8x1xf32>
    %47 = vector.shape_cast %46 : vector<8x1xf32> to vector<8xf32>
    %48 = vector.shape_cast %47 : vector<8xf32> to vector<8x1x1xf32>
    %49 = vector.broadcast %48 : vector<8x1x1xf32> to vector<8x8x16xf32>
    %50 = arith.mulf %45, %49 : vector<8x8x16xf32>
    %51 = arith.addf %44, %50 : vector<8x8x16xf32>
    %52 = vector.extract_strided_slice %35 {offsets = [0, 0, 2], sizes = [8, 8, 16], strides = [1, 1, 1]} : vector<8x10x18xf32> to vector<8x8x16xf32>
    %53 = vector.extract_strided_slice %36 {offsets = [0, 2], sizes = [8, 1], strides = [1, 1]} : vector<8x9xf32> to vector<8x1xf32>
    %54 = vector.shape_cast %53 : vector<8x1xf32> to vector<8xf32>
    %55 = vector.shape_cast %54 : vector<8xf32> to vector<8x1x1xf32>
    %56 = vector.broadcast %55 : vector<8x1x1xf32> to vector<8x8x16xf32>
    %57 = arith.mulf %52, %56 : vector<8x8x16xf32>
    %58 = arith.addf %51, %57 : vector<8x8x16xf32>
    %59 = vector.extract_strided_slice %35 {offsets = [0, 1, 0], sizes = [8, 8, 16], strides = [1, 1, 1]} : vector<8x10x18xf32> to vector<8x8x16xf32>
    %60 = vector.extract_strided_slice %36 {offsets = [0, 3], sizes = [8, 1], strides = [1, 1]} : vector<8x9xf32> to vector<8x1xf32>
    %61 = vector.shape_cast %60 : vector<8x1xf32> to vector<8xf32>
    %62 = vector.shape_cast %61 : vector<8xf32> to vector<8x1x1xf32>
    %63 = vector.broadcast %62 : vector<8x1x1xf32> to vector<8x8x16xf32>
    %64 = arith.mulf %59, %63 : vector<8x8x16xf32>
    %65 = arith.addf %58, %64 : vector<8x8x16xf32>
    %66 = vector.extract_strided_slice %35 {offsets = [0, 1, 1], sizes = [8, 8, 16], strides = [1, 1, 1]} : vector<8x10x18xf32> to vector<8x8x16xf32>
    %67 = vector.extract_strided_slice %36 {offsets = [0, 4], sizes = [8, 1], strides = [1, 1]} : vector<8x9xf32> to vector<8x1xf32>
    %68 = vector.shape_cast %67 : vector<8x1xf32> to vector<8xf32>
    %69 = vector.shape_cast %68 : vector<8xf32> to vector<8x1x1xf32>
    %70 = vector.broadcast %69 : vector<8x1x1xf32> to vector<8x8x16xf32>
    %71 = arith.mulf %66, %70 : vector<8x8x16xf32>
    %72 = arith.addf %65, %71 : vector<8x8x16xf32>
    %73 = vector.extract_strided_slice %35 {offsets = [0, 1, 2], sizes = [8, 8, 16], strides = [1, 1, 1]} : vector<8x10x18xf32> to vector<8x8x16xf32>
    %74 = vector.extract_strided_slice %36 {offsets = [0, 5], sizes = [8, 1], strides = [1, 1]} : vector<8x9xf32> to vector<8x1xf32>
    %75 = vector.shape_cast %74 : vector<8x1xf32> to vector<8xf32>
    %76 = vector.shape_cast %75 : vector<8xf32> to vector<8x1x1xf32>
    %77 = vector.broadcast %76 : vector<8x1x1xf32> to vector<8x8x16xf32>
    %78 = arith.mulf %73, %77 : vector<8x8x16xf32>
    %79 = arith.addf %72, %78 : vector<8x8x16xf32>
    %80 = vector.extract_strided_slice %35 {offsets = [0, 2, 0], sizes = [8, 8, 16], strides = [1, 1, 1]} : vector<8x10x18xf32> to vector<8x8x16xf32>
    %81 = vector.extract_strided_slice %36 {offsets = [0, 6], sizes = [8, 1], strides = [1, 1]} : vector<8x9xf32> to vector<8x1xf32>
    %82 = vector.shape_cast %81 : vector<8x1xf32> to vector<8xf32>
    %83 = vector.shape_cast %82 : vector<8xf32> to vector<8x1x1xf32>
    %84 = vector.broadcast %83 : vector<8x1x1xf32> to vector<8x8x16xf32>
    %85 = arith.mulf %80, %84 : vector<8x8x16xf32>
    %86 = arith.addf %79, %85 : vector<8x8x16xf32>
    %87 = vector.extract_strided_slice %35 {offsets = [0, 2, 1], sizes = [8, 8, 16], strides = [1, 1, 1]} : vector<8x10x18xf32> to vector<8x8x16xf32>
    %88 = vector.extract_strided_slice %36 {offsets = [0, 7], sizes = [8, 1], strides = [1, 1]} : vector<8x9xf32> to vector<8x1xf32>
    %89 = vector.shape_cast %88 : vector<8x1xf32> to vector<8xf32>
    %90 = vector.shape_cast %89 : vector<8xf32> to vector<8x1x1xf32>
    %91 = vector.broadcast %90 : vector<8x1x1xf32> to vector<8x8x16xf32>
    %92 = arith.mulf %87, %91 : vector<8x8x16xf32>
    %93 = arith.addf %86, %92 : vector<8x8x16xf32>
    %94 = vector.extract_strided_slice %35 {offsets = [0, 2, 2], sizes = [8, 8, 16], strides = [1, 1, 1]} : vector<8x10x18xf32> to vector<8x8x16xf32>
    %95 = vector.extract_strided_slice %36 {offsets = [0, 8], sizes = [8, 1], strides = [1, 1]} : vector<8x9xf32> to vector<8x1xf32>
    %96 = vector.shape_cast %95 : vector<8x1xf32> to vector<8xf32>
    %97 = vector.shape_cast %96 : vector<8xf32> to vector<8x1x1xf32>
    %98 = vector.broadcast %97 : vector<8x1x1xf32> to vector<8x8x16xf32>
    %99 = arith.mulf %94, %98 : vector<8x8x16xf32>
    %100 = arith.addf %93, %99 : vector<8x8x16xf32>
    %c0_23 = arith.constant 0 : index
    %c0_24 = arith.constant 0 : index
    %101 = vector.load %arg9[%c0_23, %c0_24] : memref<4x8xf32, #tpu.memory_space<vmem>>, vector<4x8xf32>
    %102 = vector.shape_cast %100 : vector<8x8x16xf32> to vector<8x128xf32>
    %cst_25 = arith.constant dense<0.000000e+00> : vector<4x128xf32>
    %103 = tpu.matmul %101, %102, %cst_25 {dimension_numbers = #tpu.dot_dimension_numbers<[1], [0], [0], [1], [0, 0, 1, 1], [], []>} : vector<4x8xf32>, vector<8x128xf32>, vector<4x128xf32> -> vector<4x128xf32>
    %c0_26 = arith.constant 0 : index
    %c0_27 = arith.constant 0 : index
    %104 = vector.load %arg10[%c0_26, %c0_27] : memref<4x1xf32, #tpu.memory_space<vmem>>, vector<4x1xf32>
    %105 = vector.broadcast %104 : vector<4x1xf32> to vector<4x128xf32>
    %106 = arith.addf %103, %105 : vector<4x128xf32>
    %cst_28 = arith.constant 0.000000e+00 : f32
    %107 = vector.broadcast %cst_28 : f32 to vector<4x128xf32>
    %108 = arith.maximumf %106, %107 : vector<4x128xf32>
    %109 = vector.shape_cast %108 : vector<4x128xf32> to vector<1x4x8x16xf32>
    %c0_29 = arith.constant 0 : index
    %c0_30 = arith.constant 0 : index
    %c0_31 = arith.constant 0 : index
    %c0_32 = arith.constant 0 : index
    %110 = vector.load %arg11[%c0_29, %c0_30, %c0_31, %c0_32] : memref<1x4x8x16xf32, #tpu.memory_space<vmem>>, vector<1x4x8x16xf32>
    tpu.vector_store %arg11[%c0_29, %c0_30, %c0_31, %c0_32], %109 {strides = array<i32>} : memref<1x4x8x16xf32, #tpu.memory_space<vmem>>, vector<1x4x8x16xf32>,
    return
  }
  func.func @transform_0(%arg0: i32, %arg1: i32) -> (i32, i32, i32, i32) {
    %c0_i32 = arith.constant 0 : i32
    %c0_i32_0 = arith.constant 0 : i32
    %c0_i32_1 = arith.constant 0 : i32
    %c0_i32_2 = arith.constant 0 : i32
    return %arg0, %c0_i32, %c0_i32_0, %c0_i32_1 : i32, i32, i32, i32
  }
  func.func @transform_1(%arg0: i32, %arg1: i32) -> (i32, i32, i32, i32) {
    %c0_i32 = arith.constant 0 : i32
    %c0_i32_0 = arith.constant 0 : i32
    %c0_i32_1 = arith.constant 0 : i32
    return %arg0, %c0_i32, %arg1, %c0_i32_0 : i32, i32, i32, i32
  }
  func.func @transform_2(%arg0: i32, %arg1: i32) -> (i32, i32, i32, i32) {
    %c1_i32 = arith.constant 1 : i32
    %0 = arith.muli %arg1, %c1_i32 : i32
    %c1_i32_0 = arith.constant 1 : i32
    %1 = arith.subi %0, %c1_i32_0 : i32
    %c0_i32 = arith.constant 0 : i32
    %2 = arith.maxsi %1, %c0_i32 : i32
    %c0_i32_1 = arith.constant 0 : i32
    %c0_i32_2 = arith.constant 0 : i32
    %c0_i32_3 = arith.constant 0 : i32
    return %arg0, %c0_i32_1, %2, %c0_i32_2 : i32, i32, i32, i32
  }
  func.func @transform_3(%arg0: i32, %arg1: i32) -> (i32, i32, i32, i32) {
    %c1_i32 = arith.constant 1 : i32
    %0 = arith.muli %arg1, %c1_i32 : i32
    %c1_i32_0 = arith.constant 1 : i32
    %1 = arith.addi %0, %c1_i32_0 : i32
    %c1_i32_1 = arith.constant 1 : i32
    %2 = arith.minsi %1, %c1_i32_1 : i32
    %c0_i32 = arith.constant 0 : i32
    %c0_i32_2 = arith.constant 0 : i32
    %c0_i32_3 = arith.constant 0 : i32
    return %arg0, %c0_i32, %2, %c0_i32_2 : i32, i32, i32, i32
  }
  func.func @transform_4(%arg0: i32, %arg1: i32) -> (i32, i32) {
    %c0_i32 = arith.constant 0 : i32
    %c0_i32_0 = arith.constant 0 : i32
    %c0_i32_1 = arith.constant 0 : i32
    return %c0_i32, %c0_i32_0 : i32, i32
  }
  func.func @transform_5(%arg0: i32, %arg1: i32) -> (i32, i32) {
    %c0_i32 = arith.constant 0 : i32
    %c0_i32_0 = arith.constant 0 : i32
    %c0_i32_1 = arith.constant 0 : i32
    return %c0_i32, %c0_i32_0 : i32, i32
  }
  func.func @transform_6(%arg0: i32, %arg1: i32) -> (i32, i32) {
    %c0_i32 = arith.constant 0 : i32
    %c0_i32_0 = arith.constant 0 : i32
    %c0_i32_1 = arith.constant 0 : i32
    return %c0_i32, %c0_i32_0 : i32, i32
  }
  func.func @transform_7(%arg0: i32, %arg1: i32) -> (i32, i32) {
    %c0_i32 = arith.constant 0 : i32
    %c0_i32_0 = arith.constant 0 : i32
    %c0_i32_1 = arith.constant 0 : i32
    return %c0_i32, %c0_i32_0 : i32, i32
  }
  func.func @transform_8(%arg0: i32, %arg1: i32) -> (i32, i32) {
    %c0_i32 = arith.constant 0 : i32
    %c0_i32_0 = arith.constant 0 : i32
    %c0_i32_1 = arith.constant 0 : i32
    return %c0_i32, %c0_i32_0 : i32, i32
  }
  func.func @transform_9(%arg0: i32, %arg1: i32) -> (i32, i32, i32, i32) {
    %c0_i32 = arith.constant 0 : i32
    %c0_i32_0 = arith.constant 0 : i32
    %c0_i32_1 = arith.constant 0 : i32
    return %arg0, %c0_i32, %arg1, %c0_i32_0 : i32, i32, i32, i32
  }
}

</mosaic_0001>

<bundles_post_ra>
// kernel: tpu_custom_call.1
= control target key start
LH: loop header
LB: loop body
LE: loop exit
PB: predicated region body
PF: predicated region fallthrough
CT: control target
= control target key end

     0   :  { %s4455_s0 = inlined_call_operand.hbm [shape: f32[2,4,8,8], index: 0, kind: input, shape index: {}]   ;;  %s4456_s1 = inlined_call_operand.hbm [shape: f32[2,4,16,16], index: 1, kind: input, shape index: {}]   ;;  %s4457_s2 = inlined_call_operand.hbm [shape: f32[2,4,16,16], index: 2, kind: input, shape index: {}]   ;;  %s4458_s3 = inlined_call_operand.hbm [shape: f32[2,4,16,16], index: 3, kind: input, shape index: {}]   ;;  %s4459_s4 = inlined_call_operand.vmem [shape: f32[18,8], index: 4, kind: input, shape index: {}]   ;;  %s4460_s5 = inlined_call_operand.vmem [shape: f32[8,18], index: 5, kind: input, shape index: {}]   ;;  %s4461_s6 = inlined_call_operand.vmem [shape: f32[8,9], index: 6, kind: input, shape index: {}]   ;;  %s4462_s7 = inlined_call_operand.vmem [shape: f32[4,8], index: 7, kind: input, shape index: {}]   ;;  %s4463_s8 = inlined_call_operand.vmem [shape: f32[4,1], index: 8, kind: input, shape index: {}]   ;;  %s4464_s9 = inlined_call_operand.hbm [shape: f32[2,4,16,16], index: 9, kind: output, shape index: {}]  }
   0x1   :  { %4496 = sst [smem:[#allocation35_spill]] %s4455_s0 }
   0x2   :  { %4497 = sst [smem:[#allocation36_spill]] %s4456_s1 }
   0x3   :  { %4498 = sst [smem:[#allocation37_spill]] %s4457_s2 }
   0x4   :  { %4499 = sst [smem:[#allocation38_spill]] %s4458_s3 }
   0x5   :  { %4500 = sst [smem:[#allocation39_spill]] %s4459_s4 }
   0x6   :  { %4501 = sst [smem:[#allocation40_spill]] %s4460_s5 }
   0x7   :  { %4502 = sst [smem:[#allocation41_spill]] %s4461_s6 }
   0x8   :  { %4503 = sst [smem:[#allocation42_spill]] %s4462_s7 }
   0x9   :  { %4504 = sst [smem:[#allocation43_spill]] %s4463_s8 }
   0xa   :  { %4505 = sst [smem:[#allocation44_spill]] %s4464_s9 }
   0xb   :  { %14 = vsyncpa [#allocation3], 0 }
   0xc   :  { %16 = vsyncpa [#allocation3 + $0x1], 0 }
   0xd   :  { %17 = vsyncpa [#allocation6], 0 }
   0xe   :  { %19 = vsyncpa [#allocation6 + $0x1], 0 }
   0xf   :  { %20 = vsyncpa [#allocation9], 0 }
  0x10   :  { %22 = vsyncpa [#allocation9 + $0x1], 0 }
  0x11   :  { %23 = vsyncpa [#allocation4], 0 }
  0x12   :  { %25 = vsyncpa [#allocation4 + $0x1], 0  ;;  %s3231_s30 = smov 0   ;;  %s3233_s10 = smov 0  }
  0x13   :  { %s3235_s11 = smov 0   ;;  %s3237_s12 = smov 0  }
  0x14   :  { %s3239_s13 = smov 0   ;;  %s3241_s14 = smov 0  }
  0x15   :  { %s3243_s15 = smov 0   ;;  %s3245_s16 = smov 0  }
  0x16   :  { %s3247_s17 = smov 0   ;;  %s3249_s18 = smov 0  }
  0x17   :  { %s3251_s19 = smov 0   ;;  %s3253_s20 = smov 0  }
  0x18   :  { %s3255_s21 = smov 0   ;;  %s3257_s22 = smov 0  }
  0x19   :  { %s3259_s23 = smov 0   ;;  %s3261_s24 = smov 0  }
  0x1a   :  { %s3263_s25 = smov 0  }
  0x1b LB: > { %4506 = sst [smem:[#allocation16_spill]] %s3088_s30  ;;  %s3317_s26 = sadd.s32 4294967295, %s3152_s25   ;;  %s3152_s25 = sphi %s3263_s25, %s31_s25   ;;  %s3148_s24 = sphi %s3261_s24, %s4589_s24   ;;  %s3144_s23 = sphi %s3259_s23, %s4575_s23   ;;  %s3140_s22 = sphi %s3257_s22, %s4588_s22   ;;  %s3136_s21 = sphi %s3255_s21, %s4587_s21   ;;  %s3132_s20 = sphi %s3253_s20, %s4586_s20   ;;  %s3128_s19 = sphi %s3251_s19, %s4585_s19   ;;  %s3124_s18 = sphi %s3249_s18, %s4584_s18   ;;  %s3120_s17 = sphi %s3247_s17, %s4571_s17   ;;  %s3116_s16 = sphi %s3245_s16, %s4570_s16   ;;  %s3112_s15 = sphi %s3243_s15, %s4569_s15   ;;  %s3108_s14 = sphi %s3241_s14, %s4583_s14   ;;  %s3104_s13 = sphi %s3239_s13, %s4582_s13   ;;  %s3100_s12 = sphi %s3237_s12, %s4581_s12   ;;  %s3096_s11 = sphi %s3235_s11, %s4580_s11   ;;  %s3092_s10 = sphi %s3233_s10, %s4578_s10   ;;  %s3088_s30 = sphi %s3231_s30, %s4577_s30  }
  0x1c   : > { %4507 = sst [smem:[#allocation17_spill]] %s3112_s15  ;;  %s2573_s27 = sadd.s32 4294967294, %s3152_s25  }
  0x1d   : > { %4508 = sst [smem:[#allocation18_spill]] %s3116_s16  ;;  %s40_s28 = sadd.s32 1, %s3144_s23 }
  0x1e   : > { %4509 = sst [smem:[#allocation19_spill]] %s3120_s17  ;;  %s43_s29 = sadd.s32 1, %s3148_s24 }
  0x1f   : > { %4510 = sst [smem:[#allocation20_spill]] %s3132_s20  ;;  %p41_p0 = scmp.ge.s32.totalorder %s40_s28, 2 }
  0x20   : > { %4511 = sst [smem:[#allocation21_spill]] %s3136_s21  ;;  %p4487_p1 = scmp.eq.s32.totalorder %s3152_s25, 0 }
  0x21   : > { %4512 = sst [smem:[#allocation22_spill]] %s3140_s22  ;;  %p4486_p2 = scmp.eq.s32.totalorder %s3317_s26, 0 }
  0x22   : > { %4513 = sst [smem:[#allocation23_spill]] %s3144_s23  ;;  %s78_s9 = sadd.s32 1, %s3120_s17 }
  0x23   : > { %s4591_s28 = smov (%p41_p0, %s40_s28), 0  ;;  %s4593_s29 = smov (!%p41_p0, %s43_s29), %s3148_s24 }
  0x24   : > { %4514 = sst [smem:[#allocation24_spill]] %s4591_s28  ;;  %s74_s22 = ssub.s32 %s3144_s23, %s4591_s28 }
  0x25   : > { %p85_p3 = scmp.ne.s32.totalorder %s3120_s17, %s3116_s16  ;;  %p45_p4 = scmp.ge.s32.totalorder %s4593_s29, 2 }
  0x26   : > { %p91_p5 = scmp.ne.s32.totalorder %s3116_s16, %s3112_s15  ;;  %p290_p7 = scmp.eq.s32.totalorder %s3317_s26, 3 }
  0x27   : > { %p3336_p6 = por %p85_p3, %p4487_p1  ;;  %s4595_s29 = smov (%p45_p4, %s4593_s29), 0 }
  0x28   : > { %4516 = sst [smem:[#allocation25_spill]] %s4595_s29  ;;  %p3345_p8 = por %p91_p5, %p4486_p2 }
  0x29   : > { %p3349_p9 = por %p290_p7, %p85_p3  ;;  %s3355_s15 = ssub.s32 %s3148_s24, %s4595_s29 }
  0x2a   : > { %s4517_s8 = scalar_select %p3345_p8, 1, 0 }
  0x2b   : > { %s4519_s28 = scalar_select %p3349_p9, 1, 0 }
  0x2c   : > { %4518 = sst [smem:[#allocation26_spill]] %s4517_s8  ;;  %p296_p10 = scmp.eq.s32.totalorder %s2573_s27, 3 }
  0x2d   : > { %4520 = sst [smem:[#allocation27_spill]] %s4519_s28  ;;  %s75_s4 = sor.u32 %s74_s22, %s3355_s15 }
  0x2e   : > { %p76_p11 = scmp.eq.s32.totalorder %s75_s4, 0  ;;  %p3358_p12 = por %p296_p10, %p91_p5 }
  0x2f   : > { %p4485_p13 = scmp.lt.s32.totalorder %s3152_s25, 4  ;;  %s353_s21 = sand.u32 1, %s3152_s25  }
  0x30   : > { %s4521_s6 = scalar_select %p3358_p12, 1, 0 }
  0x31   : > { %s3364_s5 = scalar_select %p76_p11, %s3120_s17, %s78_s9  }
  0x32   : > { %4522 = sst [smem:[#allocation28_spill]] %s4521_s6  ;;  %s355_s8 = sand.u32 1, %s3120_s17  }
  0x33   : > { %4523 = sst [smem:[#allocation29_spill]] %s3364_s5  ;;  %s2581_s16 = sshll.u32 %s355_s8, 5 }
  0x34   : > { %s2582_s28 = sshll.u32 %s3148_s24, 3  ;;  %s357_s22 = scalar_lea.vmem [#allocation5], %s2581_s16 }
  0x35   : > { %s361_s29 = sadd.s32 %s3144_s23, %s2582_s28  ;;  %s366_s27 = sshll.u32 %s357_s22, 4  ;;  %s367_s27 = int_to_ptr.vmem [resolvable:$true] %s366_s27 }
  0x36   : > { %s2583_s3 = sshll.u32 %s361_s29, 3  ;;  %s4524_s1 = sld [smem:[#allocation36_spill]] }
  0x37   : > { %p2638_p0 = pnand %p4485_p13, %p3336_p6  ;;  %p2591_p3 = scmp.ge.s32.totalorder %s3152_s25, 1 }
  0x38   : > { %s3378_s9 = scalar_lea.sflag [#allocation6], %s353_s21  ;;  %s4477_s30 = smov 256  }
  0x39   : > { %s4481_s16 = smov 8   ;;  %p426_p4 = scmp.lt.s32.totalorder %s3152_s25, 5 }
  0x3a   : > { %p4484_p6 = scmp.eq.s32.totalorder %s3355_s15, 0  ;;  %s50_s7 = sadd.s32 1, %s3132_s20 }
  0x3b   : > { %p3385_p5 = pnand %p2591_p3, %p426_p4  ;;  %p57_p7 = scmp.ne.s32.totalorder %s3132_s20, %s3128_s19 }
  0x3c   : > { %s363_s6 = scalar_lea.hbm %s4524_s1, %s2583_s3  ;;  %s4479_s3 = smov 128  }
  0x3d   : > { %s364_s8 = sshll.u32 %s363_s6, 4  ;;  %p63_p10 = scmp.ne.s32.totalorder %s3128_s19, %s3124_s18  ;;  %s365_s8 = int_to_ptr.hbm [resolvable:$true] %s364_s8 }
  0x3e   : > { %2640 = dma.hbm_to_vmem [thread:$0]  (!%p2638_p0), %s365_s8, 512, %s367_s27, %s3378_s9, %s4477_s30, %s4479_s3, %s4481_s16  }
  0x3f   : > { %s3398_s21 = scalar_select %p4484_p6, %s3132_s20, %s50_s7  }
  0x40   : > { %p59_p11 = por %p4487_p1, %p57_p7  ;;  %p3404_p0 = por %p4486_p2, %p63_p10 }
  0x41   : > { %4526 = sst [smem:[#allocation30_spill]] %s3398_s21  ;;  %s331_s29 = sand.u32 1, %s3132_s20  }
  0x42   : > { %s2619_s22 = sshll.u32 %s3148_s24, 5  ;;  %s2578_s18 = sshll.u32 %s331_s29, 5 }
  0x43   : > { %s4528_s0 = sld [smem:[#allocation35_spill]]  ;;  %s335_s30 = scalar_lea.vmem [#allocation2], %s2578_s18 }
  0x44   : > { %s343_s3 = sshll.u32 %s335_s30, 4  ;;  %p2635_p3 = pnand %p4485_p13, %p59_p11  ;;  %s344_s3 = int_to_ptr.vmem [resolvable:$true] %s343_s3 }
  0x45   : > { %s332_s16 = scalar_lea.sflag [#allocation3], %s331_s29  ;;  %s4529_s1 = smov 8  }
  0x46   : > { %s4530_s23 = smov 128   ;;  %s112_s21 = sadd.s32 1, %s3108_s14 }
  0x47   : > { %p119_p4 = scmp.ne.s32.totalorder %s3108_s14, %s3104_s13  ;;  %p125_p10 = scmp.ne.s32.totalorder %s3104_s13, %s3100_s12 }
  0x48   : > { %p4532_p12 = scmp.eq.s32.totalorder %s3355_s15, 0  ;;  %s4488_s29 = sshll.u32 %s3148_s24, 6 }
  0x49   : > { %s340_s8 = scalar_lea.hbm %s4528_s0, %s2619_s22  ;;  %p121_p7 = por %p119_p4, %p4487_p1 }
  0x4a   : > { %s341_s7 = sshll.u32 %s340_s8, 4  ;;  %s378_s22 = sand.u32 1, %s3108_s14   ;;  %s342_s7 = int_to_ptr.hbm [resolvable:$true] %s341_s7 }
  0x4b   : > { %2637 = dma.hbm_to_vmem [thread:$0]  (!%p2635_p3), %s342_s7, 512, %s344_s3, %s332_s16, %s4530_s23, %s4530_s23, %s4529_s1  }
  0x4c   : > { %p3428_p6 = por %p125_p10, %p4486_p2  ;;  %s2584_s18 = sshll.u32 %s378_s22, 5 }
  0x4d   : > { %s3435_s27 = scalar_select %p4532_p12, %s3108_s14, %s112_s21  }
  0x4e   : > { %s380_s4 = scalar_lea.vmem [#allocation7], %s2584_s18  ;;  %s4533_s2 = sld [smem:[#allocation37_spill]] }
  0x4f   : > { %s392_s8 = sshll.u32 %s380_s4, 4  ;;  %p3445_p11 = pnand %p4485_p13, %p121_p7  ;;  %s393_s8 = int_to_ptr.vmem [resolvable:$true] %s392_s8 }
  0x51   : > { %p2910_p3 = pneg %p3445_p11 }
  0x54   : > { %s389_s7 = scalar_lea.hbm %s4533_s2, %s4488_s29  ;;  %s2913_s3 = scalar_lea.hbm %s4533_s2, 128 }
  0x55   : > { %s390_s12 = sshll.u32 %s389_s7, 4  ;;  %s391_s12 = int_to_ptr.hbm [resolvable:$true] %s390_s12 }
  0x56   : > { %s2906_s22 = sshra.s32 %s391_s12, 4  ;;  %s2907_s22 = int_to_ptr.hbm [resolvable:$true] %s2906_s22 }
  0x57   : > { %s2908_s21 = scalar_lea.hbm %s2907_s22, 32  ;;  %p2914_p7 = scmp.lt.s32.totalorder %s2907_s22, %s4533_s2 }
  0x58   : > { %p2909_p12 = scmp.ne.s32.totalorder %s2907_s22, %s2908_s21  ;;  %p2915_p13 = scmp.lt.s32.totalorder %s2913_s3, %s2908_s21 }
  0x5a   : > { %p2911_p4 = pnand %p2910_p3, %p2909_p12  ;;  %p2916_p2 = por %p2915_p13, %p2914_p7 }
  0x5c   : > { %p2912_p10 = pneg %p2911_p4 }
  0x5e   : > { %p2917_p1 = pnand %p2916_p2, %p2912_p10 }
  0x60   : > { %2920 = shalt.err (!%p2917_p1)
}
  0x61   : > { %s4535_s29 = smov 256   ;;  %s4536_s20 = sld [smem:[#allocation16_spill]] }
  0x62   : > { %2643 = dma.hbm_to_vmem [thread:$0]  (!%p3445_p11), %s391_s12, 512, %s393_s8, %s3378_s9, %s4535_s29, %s4530_s23, %s4529_s1  }
  0x63   : > { %s146_s22 = sadd.s32 1, %s3096_s11  ;;  %p153_p1 = scmp.ne.s32.totalorder %s3096_s11, %s3092_s10 }
  0x64   : > { %s402_s0 = sand.u32 1, %s3096_s11   ;;  %p4537_p13 = scmp.eq.s32.totalorder %s3152_s25, 0 }
  0x65   : > { %p4538_p3 = scmp.eq.s32.totalorder %s3317_s26, 0  ;;  %s2588_s18 = sshll.u32 %s402_s0, 5 }
  0x66   : > { %p155_p12 = por %p153_p1, %p4537_p13  ;;  %p4540_p10 = scmp.eq.s32.totalorder %s3355_s15, 0 }
  0x67   : > { %p159_p2 = scmp.ne.s32.totalorder %s3092_s10, %s4536_s20  ;;  %s4541_s3 = sshll.u32 %s3148_s24, 6 }
  0x68   : > { %s3480_s4 = scalar_select %p4540_p10, %s3096_s11, %s146_s22  }
  0x69   : > { %p3473_p4 = por %p159_p2, %p4538_p3  ;;  %s3084_s16 = sadd.s32 8, %s4541_s3 }
  0x6a   : > { %s406_s7 = scalar_lea.vmem [#allocation8], %s2588_s18  ;;  %s4542_s12 = sld [smem:[#allocation38_spill]] }
  0x6b   : > { %s418_s2 = sshll.u32 %s406_s7, 4  ;;  %p4543_p11 = scmp.lt.s32.totalorder %s3152_s25, 4  ;;  %s419_s2 = int_to_ptr.vmem [resolvable:$true] %s418_s2 }
  0x6c   : > { %s403_s17 = scalar_lea.sflag [#allocation9], %s402_s0 }
  0x6d   : > { %p2644_p7 = pnand %p4543_p11, %p155_p12 }
  0x6e   : > { %430 = sbr.rel (%p3385_p5) target bundleno = 1709 (0x6ad), region = 56 }
  0x70   : > { %s415_s20 = scalar_lea.hbm %s4542_s12, %s3084_s16 }
  0x71   : > { %s416_s5 = sshll.u32 %s415_s20, 4  ;;  %s417_s5 = int_to_ptr.hbm [resolvable:$true] %s416_s5 }
  0x72   : > { %2646 = dma.hbm_to_vmem [thread:$0]  (!%p2644_p7), %s417_s5, 512, %s419_s2, %s403_s17, %s4535_s29, %s4530_s23, %s4529_s1  }
  0x73   : > { %s432_s15 = sand.u32 1, %s3128_s19  }
  0x74   : > { %s2592_s22 = sshll.u32 %s432_s15, 5  ;;  %s433_s18 = scalar_lea.sflag [#allocation3], %s432_s15 }
  0x75   : > { %s3495_s3 = scalar_lea.vmem [#allocation2], %s2592_s22 }
  0x76   : > { %3063 = dma.done.wait (%p3404_p0), %s433_s18, 512  }
  0x77   : > { %3065 = vsyncadd (%p3404_p0), %s433_s18, 4294966784  ;;  %s4544_s0 = sld [smem:[#allocation18_spill]]  ;;  %s442_s1 = sand.u32 1, %s3317_s26  }
  0x78   : > { %s443_s17 = scalar_lea.sflag [#allocation6], %s442_s1 }
  0x7d   : > { %s444_s2 = sand.u32 1, %s4544_s0  }
  0x7e   : > { %s3505_s5 = sshll.u32 %s444_s2, 5 }
  0x7f   : > { %s3508_s23 = scalar_lea.vmem [#allocation5], %s3505_s5 }
  0x80   : > { %3067 = dma.done.wait (%p3345_p8), %s443_s17, 512  }
  0x81   : > { %3069 = vsyncadd (%p3345_p8), %s443_s17, 4294966784  ;;  %s454_s6 = sand.u32 1, %s3104_s13  }
  0x82   : > { %s2594_s28 = sshll.u32 %s454_s6, 5 }
  0x83   : > { %s3515_s29 = scalar_lea.vmem [#allocation7], %s2594_s28 }
  0x84   : > { %3071 = dma.done.wait (%p3428_p6), %s443_s17, 512  }
  0x85   : > { %3073 = vsyncadd (%p3428_p6), %s443_s17, 4294966784  ;;  %s462_s26 = sand.u32 1, %s3092_s10  }
  0x86   : > { %s2595_s7 = sshll.u32 %s462_s26, 5  ;;  %s463_s9 = scalar_lea.sflag [#allocation9], %s462_s26 }
  0x87   : > { %s3522_s8 = scalar_lea.vmem [#allocation8], %s2595_s7 }
  0x88   : > { %3075 = dma.done.wait (%p3473_p4), %s463_s9, 512  }
  0x89   : > { %3077 = vsyncadd (%p3473_p4), %s463_s9, 4294966784  ;;  %s4546_s12 = sld [smem:[#allocation21_spill]]  ;;  %v4491_v0 = vmov 0   ;;  %vm528_vm0 = vcmask 64512   ;;  %v523_v3 = vld [vmem:[%s3495_s3] sm:$0xff]  ;;  %v1106_v11 = vld [vmem:[%s3522_s8 + $0x8] sm:$0xff] }
  0x8a   : > { %2819 = vset.pattern.permute.xlu0 %v4491_v0  ;;  %2817 = vset.pattern.permute.xlu2 %v4491_v0  ;;  %s4547_s16 = sld [smem:[#allocation40_spill]]  ;;  %v1089_v4 = vld [vmem:[%s3508_s23] sm:$0xff]  ;;  %vm1153_vm1 = vcmask 1040384   ;;  %v1090_v16 = vld [vmem:[%s3508_s23 + $0x8] sm:$0xff]  ;;  %s3158_s28 = smov 1   ;;  %v1095_v23 = vld [vmem:[%s3515_s29 + $0x10] sm:$0xff] }
  0x8b   : > { %2818 = vset.pattern.permute.xlu1 %v4491_v0  ;;  %v1105_v6 = vld [vmem:[%s3522_s8] sm:$0xff]  ;;  %v1133_v9 = vrot.slane %v1089_v4, 7  ;;  %s4548_s6 = sld [smem:[#allocation41_spill]]  ;;  %v524_v19 = vld [vmem:[%s3495_s3 + $0x8] sm:$0xff]  ;;  %v1134_v21 = vrot.slane %v1090_v16, 7  ;;  %v1091_v27 = vld [vmem:[%s3508_s23 + $0x10] sm:$0xff] }
  0x8c   : > { %v1093_v7 = vld [vmem:[%s3515_s29] sm:$0xff]  ;;  %v1094_v28 = vld [vmem:[%s3515_s29 + $0x8] sm:$0xff]  ;;  %v525_v29 = vld [vmem:[%s3495_s3 + $0x10] sm:$0xff]  ;;  %v1135_v33 = vrot.slane %v1091_v27, 7  ;;  %v3159_v50 = vmov 1   ;;  %vm1194_vm2 = vcmask 7168  }
  0x8d   : > { %v1096_v34 = vld [vmem:[%s3515_s29 + $0x18] sm:$0xff]  ;;  %v1107_v41 = vld [vmem:[%s3522_s8 + $0x10] sm:$0xff]  ;;  %vm1203_vm3 = vcmask 138240   ;;  %vm1501_vm4 = vcmask 1046528   ;;  %s4549_s9 = sld [smem:[#allocation39_spill]]  ;;  %vm1846_vm5 = vcmask 1045504  }
  0x8e   : > { %v1092_v40 = vld [vmem:[%s3508_s23 + $0x18] sm:$0xff]  ;;  %s3163_s23 = smov 126   ;;  %vm2129_vm6 = vcmask 1047556   ;;  %s3175_s22 = smov 64   ;;  %vm2269_vm7 = vcmask 130048   ;;  %vm2271_vm8 = vcmask 261120  }
  0x8f   : > { %p1109_p8 = scmp.lt.s32.totalorder %s4546_s12, 1  ;;  %p1097_p5 = scmp.gt.s32.totalorder %s4546_s12, 0  ;;  %v526_v42 = vld [vmem:[%s3495_s3 + $0x18] sm:$0xff]  ;;  %v1136_v45 = vrot.slane %v1092_v40, 7  ;;  %vm2273_vm9 = vcmask 392192   ;;  %vm2275_vm10 = vcmask 523264  }
  0x90   : > { %v527_v2 = vld [vmem:[%s4547_s16] sm:$0xff]  ;;  %s3161_s3 = smov 127   ;;  %s2601_s29 = sshll.u32 %s4546_s12, 3  ;;  %vm2277_vm11 = vcmask 654336   ;;  %vm2279_vm12 = vcmask 785408   ;;  %vm2281_vm13 = vcmask 916480  }
  0x91   : > { %s1110_s30 = scalar_select %p1109_p8, 1, 0  ;;  %556 = vmatpush.msra.mxu0 %v527_v2  ;;  %v3548_v14 = vld [vmem:[%s4548_s6] sm:$0xff] }
  0x92   : > { %s1098_s20 = scalar_select %p1097_p5, 1, 0  ;;  %2597 = vmatmul.msk.f32.vlgmr.msra.gmra.mxu0 %vm528_vm0, %v523_v3  ;;  %v1215_v20 = vrot.slane %v3548_v14, 2  ;;  %v1220_v30 = vrot.slane %v3548_v14, 7  ;;  %v1108_v49 = vld [vmem:[%s3522_s8 + $0x18] sm:$0xff]  ;;  %v3592_v53 = vperm.slane %v3548_v14, 0 }
  0x93   : > { %s1111_s21 = scvt.s32.f32 %s1110_s30  ;;  %v1216_v55 = vrot.slane %v3548_v14, 3  ;;  %v1214_v56 = vrot.slane %v3548_v14, 1  ;;  %v1218_v59 = vrot.slane %v3548_v14, 5  ;;  %v1217_v60 = vrot.slane %v3548_v14, 4  ;;  %s571_s8 = scalar_lea.vmem %s4549_s9, %s2601_s29 }
  0x94   : > { %s1099_s15 = scvt.s32.f32 %s1098_s20  ;;  %v3560_v24 = vperm.slane %v1215_v20, 0  ;;  %v3571_v36 = vperm.slane %v1220_v30, 0  ;;  %v1219_v63 = vrot.slane %v3548_v14, 6  ;;  %s3171_s30 = smov 32  }
  0x95   : > { %v3533_v1 = vstv %s1111_s21  ;;  %v3600_v57 = vperm.slane %v1214_v56, 0  ;;  %v3602_v58 = vperm.slane %v1216_v55, 0  ;;  %v3608_v61 = vperm.slane %v1217_v60, 0  ;;  %s3172_s20 = smov 16   ;;  %s3173_s21 = smov 48  }
  0x96   : > { %v1100_v5 = vstv %s1099_s15  ;;  %v1113_v8 = vmul.f32 %v3533_v1, %v1105_v6  ;;  %v1114_v15 = vmul.f32 %v3533_v1, %v1106_v11  ;;  %v1115_v43 = vmul.f32 %v3533_v1, %v1107_v41  ;;  %s3174_s15 = smov 80   ;;  %s3176_s18 = smov 96  }
  0x97   : > { %v1101_v10 = vmul.f32 %v1100_v5, %v1093_v7  ;;  %v1103_v26 = vmul.f32 %v1100_v5, %v1095_v23  ;;  %v1102_v31 = vmul.f32 %v1100_v5, %v1094_v28  ;;  %v1104_v39 = vmul.f32 %v1100_v5, %v1096_v34  ;;  %s3177_s16 = smov 112   ;;  %s4559_s6 = sld [smem:[#allocation43_spill]] }
  0x98   : > { %v1145_v12 = vrot.slane %v1113_v8, 7  ;;  %v1146_v22 = vrot.slane %v1114_v15, 7  ;;  %v1147_v46 = vrot.slane %v1115_v43, 7  ;;  %v1116_v51 = vmul.f32 %v3533_v1, %v1108_v49  ;;  %s4561_s29 = sld [smem:[#allocation22_spill]] }
  0x99   : > { %v1121_v13 = vrot.slane %v1101_v10, 7  ;;  %v1123_v32 = vrot.slane %v1103_v26, 7  ;;  %v1122_v35 = vrot.slane %v1102_v31, 7  ;;  %v1124_v44 = vrot.slane %v1104_v39, 7 }
  0x9a   : > { %v1158_v17 = vsel %vm1153_vm1, %v1133_v9, %v1145_v12  ;;  %2598 = vmatmul.msk.f32.gmra.mxu0 %vm528_vm0, %v524_v19  ;;  %v1159_v25 = vsel %vm1153_vm1, %v1134_v21, %v1146_v22  ;;  %v1160_v47 = vsel %vm1153_vm1, %v1135_v33, %v1147_v46  ;;  %v1148_v52 = vrot.slane %v1116_v51, 7 }
  0x9b   : > { %v1154_v18 = vsel %vm1153_vm1, %v1121_v13, %v1133_v9  ;;  %1172 = vrot.lane.b32.xlu0 %v1158_v17, %s3158_s28  ;;  %v1155_v37 = vsel %vm1153_vm1, %v1122_v35, %v1134_v21  ;;  %v1156_v38 = vsel %vm1153_vm1, %v1123_v32, %v1135_v33  ;;  %v1157_v48 = vsel %vm1153_vm1, %v1124_v44, %v1136_v45 }
  0x9c   : > { %1170 = vrot.lane.b32.xlu2 %v1154_v18, %s3158_s28  ;;  %1174 = vrot.lane.b32.xlu1 %v1155_v37, %s3158_s28  ;;  %v1161_v54 = vsel %vm1153_vm1, %v1136_v45, %v1148_v52  ;;  %v3610_v62 = vperm.slane %v1218_v59, 0  ;;  %v3615_v1 = vperm.slane %v1219_v63, 0  ;;  %v3160_v7 = vmov 2  }
  0x9d   : > { %v3162_v31 = vmov 3   ;;  %v3165_v55 = vmov 5   ;;  %v3166_v60 = vmov 7  }
  0x9e   : > { %s2615_s26 = sshll.u32 %s4561_s29, 3 }
  0x9f   : > { %s2406_s7 = sadd.s32 %s4546_s12, %s2615_s26  ;;  %s4562_s12 = sld [smem:[#allocation44_spill]] }
  0xa0   : > { %s2616_s9 = sshll.u32 %s2406_s7, 3 }
  0xa2   : > { %2599 = vmatmul.msk.f32.gmra.mxu0 %vm528_vm0, %v525_v29 }
  0xa3   : > { %1238 = vperm.xlu0 %2819, %v3560_v24  }
  0xa4   : > { %1176 = vrot.lane.b32.xlu2 %v1159_v25, %s3158_s28  ;;  %1180 = vrot.lane.b32.xlu1 %v1160_v47, %s3158_s28 }
  0xa5   : > { %s4563_s1 = smov %s4562_s12 }
  0xaa   : > { %2600 = vmatmul.msk.f32.gmra.mxu0 %vm528_vm0, %v526_v42 }
  0xab   : > { %1258 = vperm.xlu0 %2819, %v3571_v36  }
  0xac   : > { %1178 = vrot.lane.b32.xlu2 %v1156_v38, %s3158_s28  ;;  %1184 = vrot.lane.b32.xlu1 %v1161_v54, %s3158_s28 }
  0xb3   : > { %2822 = vset.pattern.permute.xlu0 %v3159_v50 }
  0xb4   : > { %1182 = vrot.lane.b32.xlu2 %v1157_v48, %s3158_s28  ;;  %1286 = vperm.xlu0 %2822, %v3560_v24  }
  0xb5   : > { %1234 = vperm.xlu1 %2818, %v3600_v57  }
  0xbc   : > { %1230 = vperm.xlu2 %2817, %v3592_v53   ;;  %1306 = vperm.xlu0 %2822, %v3571_v36  }
  0xbd   : > { %1246 = vperm.xlu1 %2818, %v3608_v61  }
  0xc4   : > { %1242 = vperm.xlu2 %2817, %v3602_v58   ;;  %2823 = vset.pattern.permute.xlu0 %v3160_v7 }
  0xc5   : > { %1254 = vperm.xlu1 %2818, %v3615_v1  }
  0xcc   : > { %1250 = vperm.xlu2 %2817, %v3610_v62  }
  0xd4   : > { %2820 = vset.pattern.permute.xlu2 %v3159_v50 }
  0xd5   : > { %1278 = vperm.xlu2 %2820, %v3592_v53  }
  0xdd   : > { %1290 = vperm.xlu2 %2820, %v3602_v58  }
  0xe5   : > { %1298 = vperm.xlu2 %2820, %v3610_v62  }
  0xed   : > { %2824 = vset.pattern.permute.xlu2 %v3160_v7 }
  0xf6   : > { %v1171_v2 = vpop.permute.xlu2 %1170 }
  0xf7   : > { %v1195_v20 = vsel %vm1194_vm2, 0.0, %v1171_v2 }
  0xf8   : > { %v3648_v21 = vsel %vm1203_vm3, %v1195_v20, 0.0 }
  0xfe   : > { %v3622_v3 = vpop.permute.xlu2 %1176 }
 0x106   : > { %v1179_v4 = vpop.permute.xlu2 %1178 }
 0x107   : > { %v1199_v14 = vsel %vm1194_vm2, 0.0, %v1179_v4 }
 0x108   : > { %v3642_v17 = vsel %vm1203_vm3, %v1199_v14, 0.0 }
 0x10d   : > { %v3624_v5 = vpop.permute.xlu0 %1172 }
 0x10e   : > { %v1183_v6 = vpop.permute.xlu2 %1182  ;;  %v1175_v35 = vpop.permute.xlu1 %1174 }
 0x10f   : > { %v3628_v8 = vpop.f32.mrf.mxu0  ;;  %v1201_v25 = vsel %vm1194_vm2, 0.0, %v1183_v6  ;;  %v1197_v37 = vsel %vm1194_vm2, 0.0, %v1175_v35 }
 0x110   : > { %v3655_v26 = vsel %vm1203_vm3, %v1201_v25, 0.0  ;;  %v3677_v39 = vsel %vm1203_vm3, %v1197_v37, 0.0 }
 0x115   : > { %v1239_v9 = vpop.permute.xlu0 %1238 }
 0x116   : > { %v3630_v10 = vpop.permute.xlu2 %1230  ;;  %v1263_v38 = vmul.f32 %v1239_v9, %v3642_v17  ;;  %v3690_v48 = vpop.permute.xlu1 %1180 }
 0x117   : > { %v3632_v11 = vpop.f32.mrf.mxu0  ;;  %v1261_v9 = vmul.f32 %v3630_v10, %v3648_v21 }
 0x11d   : > { %v3634_v12 = vpop.permute.xlu0 %1258 }
 0x11e   : > { %v3636_v13 = vpop.permute.xlu2 %1242  ;;  %v3696_v49 = vpop.permute.xlu1 %1184 }
 0x11f   : > { %v564_v15 = vpop.f32.mrf.mxu0 }
 0x120   : > { %638 = vxpose.xlu1.b32.start.end [1/1] (short) (narrow) %v564_v15, 24 }
 0x126   : > { %v3639_v16 = vpop.permute.xlu2 %1250  ;;  %v1287_v18 = vpop.permute.xlu0 %1286 }
 0x127   : > { %v1311_v19 = vmul.f32 %v1287_v18, %v3642_v17  ;;  %v567_v29 = vpop.f32.mrf.mxu0  ;;  %v1235_v51 = vpop.permute.xlu1 %1234 }
 0x129   : > { %1329 = vrot.lane.b32.xlu0 %v1311_v19, %s3161_s3 }
 0x12e   : > { %v3670_v33 = vpop.permute.xlu0 %1306 }
 0x12f   : > { %v1279_v22 = vpop.permute.xlu2 %1278  ;;  %v3705_v52 = vpop.permute.xlu1 %1246 }
 0x130   : > { %v1309_v23 = vmul.f32 %v1279_v22, %v3648_v21  ;;  %v1264_v22 = vmul.f32 %v3636_v13, %v3655_v26 }
 0x131   : > { %1358 = vperm.xlu0 %2823, %v3592_v53  }
 0x132   : > { %1325 = vrot.lane.b32.xlu2 %v1309_v23, %s3161_s3 }
 0x137   : > { %v1291_v27 = vpop.permute.xlu2 %1290  ;;  %v3709_v54 = vpop.permute.xlu1 %1254 }
 0x138   : > { %v1312_v28 = vmul.f32 %v1291_v27, %v3655_v26  ;;  %670 = vxpose.xlu1.b32.start.end [1/1] (short) (narrow) %v567_v29, 24 }
 0x139   : > { %1378 = vperm.xlu0 %2823, %v3610_v62  }
 0x13a   : > { %1331 = vrot.lane.b32.xlu2 %v1312_v28, %s3161_s3 }
 0x13f   : > { %v3663_v30 = vpop.permute.xlu2 %1298 }
 0x141   : > { %2827 = vset.pattern.permute.xlu0 %v3162_v31 }
 0x142   : > { %1362 = vperm.xlu2 %2824, %v3600_v57  }
 0x14a   : > { %1370 = vperm.xlu2 %2824, %v3602_v58  }
 0x152   : > { %1382 = vperm.xlu2 %2824, %v3615_v1  }
 0x15a   : > { %2828 = vset.pattern.permute.xlu2 %v3162_v31 }
 0x18b   : > { %2821 = vset.pattern.permute.xlu1 %v3159_v50  ;;  %v3164_v50 = vmov 4  }
 0x18c   : > { %v3667_v32 = vpop.permute.xlu2 %1325 }
 0x18d   : > { %v1349_v14 = vadd.f32 %v3667_v32, %v1261_v9  ;;  %v1198_v32 = vsel %vm1194_vm2, 0.0, %v3622_v3 }
 0x194   : > { %v3672_v34 = vpop.permute.xlu2 %1331 }
 0x195   : > { %v1352_v23 = vadd.f32 %v3672_v34, %v1264_v22  ;;  %v572_v22 = vld [vmem:[%s571_s8] sm:$0xff] }
 0x19b   : > { %v1330_v40 = vpop.permute.xlu0 %1329 }
 0x19c   : > { %v1363_v41 = vpop.permute.xlu2 %1362  ;;  %v3679_v42 = vadd.f32 %v1330_v40, %v1263_v38  ;;  %v1262_v38 = vmul.f32 %v1235_v51, %v3677_v39 }
 0x19d   : > { %v1390_v43 = vmul.f32 %v1363_v41, %v3677_v39 }
 0x19f   : > { %1407 = vrot.lane.b32.xlu2 %v1390_v43, %s3163_s23 }
 0x1a2   : > { %1282 = vperm.xlu1 %2821, %v3600_v57  }
 0x1a3   : > { %v1359_v44 = vpop.permute.xlu0 %1358 }
 0x1a4   : > { %v1389_v45 = vmul.f32 %v1359_v44, %v3648_v21  ;;  %v1371_v46 = vpop.permute.xlu2 %1370 }
 0x1a5   : > { %v1392_v47 = vmul.f32 %v1371_v46, %v3655_v26 }
 0x1a6   : > { %1405 = vrot.lane.b32.xlu0 %v1389_v45, %s3163_s23 }
 0x1a7   : > { %1446 = vperm.xlu2 %2828, %v3560_v24  }
 0x1aa   : > { %1294 = vperm.xlu1 %2821, %v3608_v61  }
 0x1ac   : > { %v3770_v35 = vpop.permute.xlu2 %1382 }
 0x1ae   : > { %1411 = vrot.lane.b32.xlu0 %v1392_v47, %s3163_s23 }
 0x1af   : > { %1454 = vperm.xlu2 %2828, %v3608_v61  }
 0x1b2   : > { %1302 = vperm.xlu1 %2821, %v3615_v1  }
 0x1b6   : > { %1442 = vperm.xlu0 %2827, %v3600_v57  }
 0x1b7   : > { %1466 = vperm.xlu2 %2828, %v3571_v36  }
 0x1ba   : > { %2825 = vset.pattern.permute.xlu1 %v3160_v7  ;;  %v3738_v7 = vpop.permute.xlu0 %1378 }
 0x1be   : > { %1462 = vperm.xlu0 %2827, %v3615_v1  }
 0x1bf   : > { %2831 = vset.pattern.permute.xlu2 %v3164_v50 }
 0x1c0   : > { %1551 = vperm.xlu2 %2831, %v3560_v24  }
 0x1c4   : > { %v3715_v56 = vpop.trf.xlu1 }
 0x1c6   : > { %2830 = vset.pattern.permute.xlu0 %v3164_v50 }
 0x1c7   : > { %1547 = vperm.xlu0 %2830, %v3600_v57  }
 0x1c8   : > { %1559 = vperm.xlu2 %2831, %v3608_v61  }
 0x1cc   : > { %v3719_v59 = vpop.trf.xlu1 }
 0x1cf   : > { %1567 = vperm.xlu0 %2830, %v3615_v1  }
 0x1d0   : > { %1571 = vperm.xlu2 %2831, %v3571_v36  }
 0x1d4   : > { %v3727_v63 = vpop.trf.xlu1 }
 0x1d7   : > { %2833 = vset.pattern.permute.xlu0 %v3165_v55 }
 0x1d8   : > { %2834 = vset.pattern.permute.xlu2 %v3165_v55  ;;  %1687 = vperm.xlu0 %2833, %v3615_v1  }
 0x1d9   : > { %1667 = vperm.xlu2 %2834, %v3600_v57  }
 0x1dc   : > { %v3731_v2 = vpop.trf.xlu1 }
 0x1e0   : > { %1683 = vperm.xlu0 %2833, %v3610_v62  }
 0x1e1   : > { %1691 = vperm.xlu2 %2834, %v3571_v36  }
 0x1e4   : > { %v3734_v4 = vpop.trf.xlu1 }
 0x1e8   : > { %2836 = vset.pattern.permute.xlu0 %v3166_v60 }
 0x1e9   : > { %1663 = vperm.xlu2 %2834, %v3592_v53   ;;  %1912 = vperm.xlu0 %2836, %v3615_v1  }
 0x1ec   : > { %v3736_v6 = vpop.trf.xlu1 }
 0x1f1   : > { %2837 = vset.pattern.permute.xlu2 %v3166_v60  ;;  %1904 = vperm.xlu0 %2836, %v3608_v61  }
 0x1f2   : > { %1892 = vperm.xlu2 %2837, %v3600_v57  }
 0x1f9   : > { %1888 = vperm.xlu0 %2836, %v3592_v53   ;;  %v1408_v45 = vpop.permute.xlu2 %1407 }
 0x1fa   : > { %1916 = vperm.xlu2 %2837, %v3571_v36  }
 0x202   : > { %1908 = vperm.xlu2 %2837, %v3610_v62  }
 0x214   : > { %v1283_v19 = vpop.permute.xlu1 %1282 }
 0x215   : > { %v1310_v20 = vmul.f32 %v1283_v19, %v3677_v39 }
 0x217   : > { %1327 = vrot.lane.b32.xlu1 %v1310_v20, %s3161_s3  ;;  %v573_v20 = vld [vmem:[%s571_s8 + $0x8] sm:$0x3] }
 0x218   : > { %v1406_v15 = vpop.permute.xlu0 %1405  ;;  %2602 = vmatpush.xpose.msk.msra.mxu1 %vm528_vm0, %v573_v20  ;;  %2620 = vmatpush.xpose.msk.msra.mxu2 %vm528_vm0, %v573_v20 }
 0x219   : > { %v3743_v18 = vadd.f32 %v1406_v15, %v1349_v14  ;;  %2621 = vmatpush.xpose.msk.msra.mxu3 %vm528_vm0, %v573_v20 }
 0x21b   : > { %574 = vxpose.xlu0.b32.start.end [1/1] (short) (narrow) %v3628_v8, 24 }
 0x21c   : > { %v3762_v13 = vpop.permute.xlu1 %1294  ;;  %2603 = vmatpush.xpose.msk.msra.mxu1 %vm528_vm0, %v572_v22  ;;  %2622 = vmatpush.xpose.msk.msra.mxu2 %vm528_vm0, %v572_v22 }
 0x21d   : > { %2623 = vmatpush.xpose.msk.msra.mxu3 %vm528_vm0, %v572_v22 }
 0x21f   : > { %1366 = vperm.xlu1 %2825, %v3560_v24  }
 0x220   : > { %v1412_v25 = vpop.permute.xlu0 %1411 }
 0x221   : > { %v3751_v27 = vadd.f32 %v1412_v25, %v1352_v23 }
 0x224   : > { %v3768_v34 = vpop.permute.xlu1 %1302 }
 0x227   : > { %1374 = vperm.xlu1 %2825, %v3608_v61  }
 0x228   : > { %v1443_v8 = vpop.permute.xlu0 %1442 }
 0x22f   : > { %1386 = vperm.xlu1 %2825, %v3571_v36  }
 0x230   : > { %v3758_v10 = vpop.permute.xlu0 %1462 }
 0x233   : > { %606 = vxpose.xlu0.b32.start.end [1/1] (short) (narrow) %v3632_v11, 24  ;;  %v3773_v11 = vsel %vm1203_vm3, %v1198_v32, 0.0 }
 0x234   : > { %v1472_v37 = vmul.f32 %v1443_v8, %v3773_v11 }
 0x236   : > { %v1506_v41 = vrot.slane %v1472_v37, 1 }
 0x237   : > { %2826 = vset.pattern.permute.xlu1 %v3162_v31  ;;  %v1471_v31 = vmul.f32 %v1443_v8, %v3677_v39 }
 0x239   : > { %v3760_v28 = vpop.permute.xlu0 %1547  ;;  %v1505_v40 = vrot.slane %v1471_v31, 1 }
 0x23b   : > { %v1507_v47 = vsel %vm1501_vm4, %v1505_v40, %v1506_v41 }
 0x241   : > { %v3764_v29 = vpop.permute.xlu0 %1567 }
 0x24a   : > { %v3778_v44 = vpop.permute.xlu0 %1687 }
 0x252   : > { %v3784_v19 = vpop.permute.xlu0 %1683 }
 0x25b   : > { %v3792_v51 = vpop.permute.xlu0 %1912 }
 0x263   : > { %v3801_v23 = vpop.permute.xlu0 %1904 }
 0x26b   : > { %v3804_v25 = vpop.permute.xlu0 %1888 }
 0x289   : > { %v1328_v43 = vpop.permute.xlu1 %1327 }
 0x28a   : > { %v1350_v3 = vadd.f32 %v1328_v43, %v1262_v38 }
 0x28c   : > { %v1430_v46 = vadd.f32 %v1408_v45, %v1350_v3 }
 0x28e   : > { %v3781_v9 = vadd.f32 %v1507_v47, %v1430_v46 }
 0x291   : > { %v1367_v14 = vpop.permute.xlu1 %1366 }
 0x292   : > { %v1391_v15 = vmul.f32 %v1367_v14, %v3642_v17 }
 0x294   : > { %1409 = vrot.lane.b32.xlu1 %v1391_v15, %s3163_s23 }
 0x29c   : > { %1438 = vperm.xlu1 %2826, %v3592_v53  }
 0x2a4   : > { %1450 = vperm.xlu1 %2826, %v3602_v58  }
 0x2ac   : > { %1458 = vperm.xlu1 %2826, %v3610_v62  }
 0x2b4   : > { %2829 = vset.pattern.permute.xlu1 %v3164_v50 }
 0x2b5   : > { %1543 = vperm.xlu1 %2829, %v3592_v53  }
 0x2bd   : > { %1555 = vperm.xlu1 %2829, %v3602_v58  }
 0x2bf   : > { %v590_v8 = vpop.trf.xlu0 }
 0x2c0   : > { %v714_v32 = vrot.slane %v590_v8, 2  ;;  %v715_v31 = vrot.slane %v590_v8, 4  ;;  %v716_v37 = vrot.slane %v590_v8, 6  ;;  %738 = vst [vmem:[#allocation1] ss:$4 sm:$0xff] %v590_v8 }
 0x2c2   : > { %740 = vst [vmem:[#allocation1 + $0x1] ss:$4 sm:$0xff] %v714_v32 }
 0x2c3   : > { %742 = vst [vmem:[#allocation1 + $0x2] ss:$4 sm:$0xff] %v715_v31 }
 0x2c4   : > { %744 = vst [vmem:[#allocation1 + $0x3] ss:$4 sm:$0xff] %v716_v37 }
 0x2c5   : > { %1563 = vperm.xlu1 %2829, %v3610_v62  }
 0x2c7   : > { %v591_v38 = vpop.trf.xlu0 }
 0x2c8   : > { %v717_v40 = vrot.slane %v591_v38, 2  ;;  %v718_v41 = vrot.slane %v591_v38, 4  ;;  %v719_v43 = vrot.slane %v591_v38, 6  ;;  %746 = vst [vmem:[#allocation1 + $0x20] ss:$4 sm:$0xff] %v591_v38  ;;  %v727_v38 = vrot.slane %v3715_v56, 4 }
 0x2ca   : > { %748 = vst [vmem:[#allocation1 + $0x21] ss:$4 sm:$0xff] %v717_v40  ;;  %v728_v40 = vrot.slane %v3715_v56, 6 }
 0x2cb   : > { %v753_v50 = vld.sshfl [vmem:[#allocation1] sm:$0xff pattern:$0x73625140]  ;;  %750 = vst [vmem:[#allocation1 + $0x22] ss:$4 sm:$0xff] %v718_v41 }
 0x2cc   : > { %752 = vst [vmem:[#allocation1 + $0x23] ss:$4 sm:$0xff] %v719_v43  ;;  %2604 = vmatmul.msk.f32.vlgmr.msra.gmra.mxu1 %vm528_vm0, %v753_v50  ;;  %v729_v43 = vrot.slane %v3719_v59, 2  ;;  %v730_v50 = vrot.slane %v3719_v59, 4 }
 0x2cd   : > { %2832 = vset.pattern.permute.xlu1 %v3165_v55  ;;  %v726_v55 = vrot.slane %v3715_v56, 2 }
 0x2ce   : > { %1675 = vperm.xlu1 %2832, %v3602_v58  }
 0x2cf   : > { %v592_v3 = vpop.trf.xlu0 }
 0x2d0   : > { %755 = vst [vmem:[#allocation1] ss:$4 sm:$0xff] %v592_v3 }
 0x2d3   : > { %v754_v45 = vld.sshfl [vmem:[#allocation1 + $0x20] sm:$0xff pattern:$0x73625140] }
 0x2d4   : > { %2605 = vmatmul.msk.f32.gmra.mxu1 %vm528_vm0, %v754_v45  ;;  %v731_v45 = vrot.slane %v3719_v59, 6 }
 0x2d6   : > { %1671 = vperm.xlu1 %2832, %v3560_v24  }
 0x2d7   : > { %v622_v46 = vpop.trf.xlu0 }
 0x2d8   : > { %v720_v47 = vrot.slane %v622_v46, 2  ;;  %v721_v14 = vrot.slane %v622_v46, 4  ;;  %v722_v15 = vrot.slane %v622_v46, 6  ;;  %756 = vst [vmem:[#allocation1 + $0x1] ss:$4 sm:$0xff] %v622_v46 }
 0x2da   : > { %757 = vst [vmem:[#allocation1 + $0x2] ss:$4 sm:$0xff] %v720_v47  ;;  %v734_v47 = vrot.slane %v3731_v2, 6 }
 0x2db   : > { %758 = vst [vmem:[#allocation1 + $0x3] ss:$4 sm:$0xff] %v721_v14  ;;  %v735_v14 = vrot.slane %v3734_v4, 2 }
 0x2dc   : > { %759 = vst [vmem:[#allocation1 + $0x20] ss:$4 sm:$0xff] %v722_v15 }
 0x2de   : > { %1679 = vperm.xlu1 %2832, %v3608_v61  }
 0x2df   : > { %v623_v20 = vpop.trf.xlu0 }
 0x2e0   : > { %v723_v22 = vrot.slane %v623_v20, 2  ;;  %760 = vst [vmem:[#allocation1 + $0x21] ss:$4 sm:$0xff] %v623_v20  ;;  %v724_v8 = vrot.slane %v623_v20, 4  ;;  %v725_v31 = vrot.slane %v623_v20, 6  ;;  %v737_v20 = vrot.slane %v3734_v4, 6 }
 0x2e2   : > { %v763_v32 = vld.sshfl [vmem:[#allocation1] sm:$0xff pattern:$0x73625140]  ;;  %761 = vst [vmem:[#allocation1 + $0x22] ss:$4 sm:$0xff] %v723_v22  ;;  %v3167_v22 = vmov 8  }
 0x2e3   : > { %767 = vst [vmem:[#allocation1 + $0x2] ss:$4 sm:$0xff] %v3715_v56  ;;  %2606 = vmatmul.msk.f32.gmra.mxu1 %vm528_vm0, %v763_v32  ;;  %v732_v56 = vrot.slane %v3731_v2, 2 }
 0x2e4   : > { %768 = vst [vmem:[#allocation1 + $0x3] ss:$4 sm:$0xff] %v726_v55  ;;  %v1447_v55 = vpop.permute.xlu2 %1446 }
 0x2e5   : > { %762 = vst [vmem:[#allocation1 + $0x23] ss:$4 sm:$0xff] %v724_v8  ;;  %v1473_v32 = vmul.f32 %v1447_v55, %v3642_v17 }
 0x2e6   : > { %765 = vst [vmem:[#allocation1] ss:$4 sm:$0xff] %v725_v31  ;;  %2835 = vset.pattern.permute.xlu1 %v3166_v60  ;;  %v733_v60 = vrot.slane %v3731_v2, 4 }
 0x2e7   : > { %v624_v37 = vpop.trf.xlu0  ;;  %1900 = vperm.xlu1 %2835, %v3602_v58  }
 0x2e8   : > { %766 = vst [vmem:[#allocation1 + $0x1] ss:$4 sm:$0xff] %v624_v37 }
 0x2ec   : > { %v764_v41 = vld.sshfl [vmem:[#allocation1 + $0x20] sm:$0xff pattern:$0x73625140] }
 0x2ed   : > { %769 = vst [vmem:[#allocation1 + $0x20] ss:$4 sm:$0xff] %v727_v38  ;;  %2607 = vmatmul.msk.f32.gmra.mxu1 %vm528_vm0, %v764_v41 }
 0x2ee   : > { %770 = vst [vmem:[#allocation1 + $0x21] ss:$4 sm:$0xff] %v728_v40 }
 0x2ef   : > { %771 = vst [vmem:[#allocation1 + $0x22] ss:$4 sm:$0xff] %v3719_v59  ;;  %v773_v3 = vld.sshfl [vmem:[#allocation1] sm:$0xff pattern:$0x73625140]  ;;  %1896 = vperm.xlu1 %2835, %v3560_v24   ;;  %v3836_v59 = vpop.permute.xlu1 %1374 }
 0x2f0   : > { %772 = vst [vmem:[#allocation1 + $0x23] ss:$4 sm:$0xff] %v729_v43  ;;  %2608 = vmatmul.msk.f32.vlgmr.msra.gmra.mxu2 %vm528_vm0, %v773_v3  ;;  %v1196_v3 = vsel %vm1194_vm2, 0.0, %v3624_v5 }
 0x2f1   : > { %775 = vst [vmem:[#allocation1] ss:$4 sm:$0xff] %v730_v50 }
 0x2f2   : > { %776 = vst [vmem:[#allocation1 + $0x1] ss:$4 sm:$0xff] %v731_v45  ;;  %v3866_v45 = vsel %vm1203_vm3, %v1196_v3, 0.0 }
 0x2f3   : > { %777 = vst [vmem:[#allocation1 + $0x2] ss:$4 sm:$0xff] %v3727_v63  ;;  %v736_v63 = vrot.slane %v3734_v4, 4 }
 0x2f4   : > { %778 = vst [vmem:[#allocation1 + $0x3] ss:$4 sm:$0xff] %v3731_v2  ;;  %v1200_v2 = vsel %vm1194_vm2, 0.0, %v3690_v48 }
 0x2f7   : > { %v774_v46 = vld.sshfl [vmem:[#allocation1 + $0x20] sm:$0xff pattern:$0x73625140]  ;;  %2838 = vset.pattern.permute.xlu1 %v3167_v22  ;;  %v3848_v8 = vpop.permute.xlu1 %1386 }
 0x2f8   : > { %779 = vst [vmem:[#allocation1 + $0x20] ss:$4 sm:$0xff] %v732_v56  ;;  %2609 = vmatmul.msk.f32.vlgmr.msra.gmra.mxu3 %vm528_vm0, %v774_v46  ;;  %2020 = vperm.xlu1 %2838, %v3602_v58  }
 0x2f9   : > { %780 = vst [vmem:[#allocation1 + $0x21] ss:$4 sm:$0xff] %v733_v60 }
 0x2fa   : > { %781 = vst [vmem:[#allocation1 + $0x22] ss:$4 sm:$0xff] %v734_v47 }
 0x2fb   : > { %782 = vst [vmem:[#allocation1 + $0x23] ss:$4 sm:$0xff] %v3734_v4  ;;  %v783_v15 = vld.sshfl [vmem:[#allocation1] sm:$0xff pattern:$0x73625140]  ;;  %v3851_v4 = vsel %vm1203_vm3, %v1200_v2, 0.0 }
 0x2fc   : > { %785 = vst [vmem:[#allocation1] ss:$4 sm:$0xff] %v735_v14  ;;  %v1474_v31 = vmul.f32 %v1447_v55, %v3851_v4  ;;  %v1202_v14 = vsel %vm1194_vm2, 0.0, %v3696_v49 }
 0x2fd   : > { %786 = vst [vmem:[#allocation1 + $0x1] ss:$4 sm:$0xff] %v736_v63 }
 0x2fe   : > { %787 = vst [vmem:[#allocation1 + $0x2] ss:$4 sm:$0xff] %v737_v20  ;;  %v1509_v38 = vrot.slane %v1474_v31, 1 }
 0x2ff   : > { %788 = vst [vmem:[#allocation1 + $0x3] ss:$4 sm:$0xff] %v3736_v6  ;;  %v1508_v6 = vrot.slane %v1473_v32, 1 }
 0x300   : > { %2610 = vmatmul.msk.f32.gmra.mxu3 %vm528_vm0, %v783_v15  ;;  %2032 = vperm.xlu1 %2838, %v3615_v1   ;;  %v3878_v15 = vsel %vm1203_vm3, %v1202_v14, 0.0 }
 0x301   : > { %v1510_v41 = vsel %vm1501_vm4, %v1508_v6, %v1509_v38 }
 0x302   : > { %v784_v37 = vld.sshfl [vmem:[#allocation1 + $0x20] sm:$0xff pattern:$0x73625140] }
 0x306   : > { %v1410_v40 = vpop.permute.xlu1 %1409  ;;  %v789_v50 = vld.sshfl [vmem:[#allocation1] sm:$0xff pattern:$0x73625140] }
 0x307   : > { %v1431_v48 = vadd.f32 %v1410_v40, %v3679_v42 }
 0x308   : > { %2611 = vmatmul.msk.f32.gmra.mxu3 %vm528_vm0, %v784_v37  ;;  %2016 = vperm.xlu1 %2838, %v3560_v24  }
 0x309   : > { %v3860_v43 = vadd.f32 %v1510_v41, %v1431_v48 }
 0x30e   : > { %v1439_v56 = vpop.permute.xlu1 %1438 }
 0x30f   : > { %v1469_v60 = vmul.f32 %v1439_v56, %v3648_v21  ;;  %v1470_v42 = vmul.f32 %v1439_v56, %v3866_v45 }
 0x310   : > { %2612 = vmatmul.msk.f32.gmra.mxu3 %vm528_vm0, %v789_v50  ;;  %2028 = vperm.xlu1 %2838, %v3610_v62  }
 0x311   : > { %v1502_v46 = vrot.slane %v1469_v60, 1  ;;  %v1503_v47 = vrot.slane %v1470_v42, 1 }
 0x313   : > { %v1504_v63 = vsel %vm1501_vm4, %v1502_v46, %v1503_v47 }
 0x314   : > { %v3875_v5 = vadd.f32 %v1504_v63, %v3743_v18 }
 0x316   : > { %4550 = vst [vmem:[#allocation31_spill] sm:$0xff] %v3875_v5  ;;  %v1451_v20 = vpop.permute.xlu1 %1450 }
 0x317   : > { %v1475_v2 = vmul.f32 %v1451_v20, %v3655_v26  ;;  %v1476_v55 = vmul.f32 %v1451_v20, %v3878_v15 }
 0x319   : > { %v1511_v32 = vrot.slane %v1475_v2, 1  ;;  %v1512_v31 = vrot.slane %v1476_v55, 1 }
 0x31b   : > { %v1513_v37 = vsel %vm1501_vm4, %v1511_v32, %v1512_v31 }
 0x31c   : > { %v3884_v6 = vadd.f32 %v1513_v37, %v3751_v27 }
 0x349   : > { %v831_v49 = vpop.f32.mrf.mxu1 }
 0x34a   : > { %v867_v38 = vrot.slane %v831_v49, 2  ;;  %v868_v40 = vrot.slane %v831_v49, 4  ;;  %v869_v18 = vrot.slane %v831_v49, 6  ;;  %894 = vst [vmem:[#allocation1] ss:$4 sm:$0xff] %v831_v49 }
 0x34c   : > { %896 = vst [vmem:[#allocation1 + $0x1] ss:$4 sm:$0xff] %v867_v38 }
 0x34d   : > { %898 = vst [vmem:[#allocation1 + $0x2] ss:$4 sm:$0xff] %v868_v40 }
 0x34e   : > { %900 = vst [vmem:[#allocation1 + $0x3] ss:$4 sm:$0xff] %v869_v18 }
 0x351   : > { %v834_v48 = vpop.f32.mrf.mxu1 }
 0x352   : > { %v870_v41 = vrot.slane %v834_v48, 2  ;;  %v871_v50 = vrot.slane %v834_v48, 4  ;;  %v872_v3 = vrot.slane %v834_v48, 6  ;;  %902 = vst [vmem:[#allocation1 + $0x20] ss:$4 sm:$0xff] %v834_v48 }
 0x354   : > { %904 = vst [vmem:[#allocation1 + $0x21] ss:$4 sm:$0xff] %v870_v41 }
 0x355   : > { %v909_v56 = vld.sshfl [vmem:[#allocation1] sm:$0xff pattern:$0x73625140]  ;;  %906 = vst [vmem:[#allocation1 + $0x22] ss:$4 sm:$0xff] %v871_v50 }
 0x356   : > { %908 = vst [vmem:[#allocation1 + $0x23] ss:$4 sm:$0xff] %v872_v3  ;;  %961 = vxpose.xlu2.b32.start [1/3] (short) (narrow) %v909_v56, 16 }
 0x35d   : > { %v910_v27 = vld.sshfl [vmem:[#allocation1 + $0x20] sm:$0xff pattern:$0x73625140] }
 0x35e   : > { %962 = vxpose.xlu2.b32.cont [2/3] (short) (narrow) %v910_v27, 16 }
 0x360   : > { %v837_v60 = vpop.f32.mrf.mxu1 }
 0x361   : > { %v873_v42 = vrot.slane %v837_v60, 2  ;;  %v874_v46 = vrot.slane %v837_v60, 4  ;;  %911 = vst [vmem:[#allocation1] ss:$4 sm:$0xff] %v837_v60  ;;  %v875_v47 = vrot.slane %v837_v60, 6 }
 0x363   : > { %913 = vst [vmem:[#allocation1 + $0x20] ss:$4 sm:$0xff] %v873_v42 }
 0x364   : > { %914 = vst [vmem:[#allocation1 + $0x21] ss:$4 sm:$0xff] %v874_v46 }
 0x365   : > { %915 = vst [vmem:[#allocation1 + $0x22] ss:$4 sm:$0xff] %v875_v47 }
 0x368   : > { %v912_v14 = vld.sshfl [vmem:[#allocation1] sm:$0xff pattern:$0x73625140] }
 0x369   : > { %963 = vxpose.xlu2.b32.end [3/3] (short) (narrow) %v912_v14, 16 }
 0x36a   : > { %v840_v63 = vpop.f32.mrf.mxu1 }
 0x36b   : > { %v876_v20 = vrot.slane %v840_v63, 2  ;;  %v877_v2 = vrot.slane %v840_v63, 4  ;;  %v878_v55 = vrot.slane %v840_v63, 6  ;;  %916 = vst [vmem:[#allocation1 + $0x23] ss:$4 sm:$0xff] %v840_v63 }
 0x36d   : > { %918 = vst [vmem:[#allocation1] ss:$4 sm:$0xff] %v876_v20 }
 0x36e   : > { %919 = vst [vmem:[#allocation1 + $0x1] ss:$4 sm:$0xff] %v877_v2  ;;  %v3886_v2 = vpop.permute.xlu2 %1454 }
 0x36f   : > { %920 = vst [vmem:[#allocation1 + $0x2] ss:$4 sm:$0xff] %v878_v55 }
 0x370   : > { %4551 = vst [vmem:[#allocation32_spill] sm:$0xff] %v3886_v2 }
 0x372   : > { %v917_v32 = vld.sshfl [vmem:[#allocation1 + $0x20] sm:$0xff pattern:$0x73625140] }
 0x373   : > { %993 = vxpose.xlu2.b32.start [1/3] (short) (narrow) %v917_v32, 16  ;;  %v843_v31 = vpop.f32.mrf.mxu2 }
 0x374   : > { %v879_v37 = vrot.slane %v843_v31, 2  ;;  %921 = vst [vmem:[#allocation1 + $0x3] ss:$4 sm:$0xff] %v843_v31  ;;  %v880_v49 = vrot.slane %v843_v31, 4  ;;  %v881_v38 = vrot.slane %v843_v31, 6 }
 0x376   : > { %922 = vst [vmem:[#allocation1 + $0x20] ss:$4 sm:$0xff] %v879_v37 }
 0x37b   : > { %v846_v40 = vpop.f32.mrf.mxu3  ;;  %v923_v18 = vld.sshfl [vmem:[#allocation1] sm:$0xff pattern:$0x73625140] }
 0x37c   : > { %994 = vxpose.xlu2.b32.cont [2/3] (short) (narrow) %v923_v18, 16  ;;  %925 = vst [vmem:[#allocation1] ss:$4 sm:$0xff] %v880_v49  ;;  %v882_v48 = vrot.slane %v846_v40, 2  ;;  %v883_v50 = vrot.slane %v846_v40, 4  ;;  %v884_v3 = vrot.slane %v846_v40, 6 }
 0x37d   : > { %926 = vst [vmem:[#allocation1 + $0x1] ss:$4 sm:$0xff] %v881_v38  ;;  %v924_v41 = vld.sshfl [vmem:[#allocation1 + $0x20] sm:$0xff pattern:$0x73625140] }
 0x37e   : > { %927 = vst [vmem:[#allocation1 + $0x2] ss:$4 sm:$0xff] %v846_v40  ;;  %v3888_v40 = vpop.permute.xlu2 %1466 }
 0x37f   : > { %928 = vst [vmem:[#allocation1 + $0x3] ss:$4 sm:$0xff] %v882_v48 }
 0x380   : > { %929 = vst [vmem:[#allocation1 + $0x20] ss:$4 sm:$0xff] %v883_v50 }
 0x381   : > { %930 = vst [vmem:[#allocation1 + $0x21] ss:$4 sm:$0xff] %v884_v3 }
 0x382   : > { %4552 = vst [vmem:[#allocation33_spill] sm:$0xff] %v3888_v40 }
 0x383   : > { %v849_v56 = vpop.f32.mrf.mxu3 }
 0x384   : > { %v885_v27 = vrot.slane %v849_v56, 2  ;;  %931 = vst [vmem:[#allocation1 + $0x22] ss:$4 sm:$0xff] %v849_v56  ;;  %995 = vxpose.xlu2.b32.end [3/3] (short) (narrow) %v924_v41, 16  ;;  %v886_v60 = vrot.slane %v849_v56, 4  ;;  %v887_v47 = vrot.slane %v849_v56, 6 }
 0x386   : > { %932 = vst [vmem:[#allocation1 + $0x23] ss:$4 sm:$0xff] %v885_v27  ;;  %v933_v42 = vld.sshfl [vmem:[#allocation1] sm:$0xff pattern:$0x73625140]  ;;  %v1552_v41 = vpop.permute.xlu2 %1551  ;;  %v3894_v27 = vpop.permute.xlu1 %1458 }
 0x387   : > { %1025 = vxpose.xlu0.b32.start [1/3] (short) (narrow) %v933_v42, 16  ;;  %935 = vst [vmem:[#allocation1] ss:$4 sm:$0xff] %v886_v60 }
 0x388   : > { %4553 = vst [vmem:[#allocation34_spill] sm:$0xff] %v3894_v27 }
 0x38b   : > { %v852_v46 = vpop.f32.mrf.mxu3 }
 0x38c   : > { %v888_v14 = vrot.slane %v852_v46, 2  ;;  %v889_v63 = vrot.slane %v852_v46, 4  ;;  %v890_v32 = vrot.slane %v852_v46, 6 }
 0x38d   : > { %v934_v20 = vld.sshfl [vmem:[#allocation1 + $0x20] sm:$0xff pattern:$0x73625140] }
 0x38e   : > { %937 = vst [vmem:[#allocation1 + $0x20] ss:$4 sm:$0xff] %v887_v47  ;;  %v936_v55 = vld.sshfl [vmem:[#allocation1] sm:$0xff pattern:$0x73625140]  ;;  %v3890_v3 = vpop.permute.xlu2 %1559  ;;  %v3898_v42 = vpop.permute.xlu1 %1543 }
 0x38f   : > { %1026 = vxpose.xlu0.b32.cont [2/3] (short) (narrow) %v934_v20, 16  ;;  %938 = vst [vmem:[#allocation1 + $0x21] ss:$4 sm:$0xff] %v852_v46 }
 0x390   : > { %939 = vst [vmem:[#allocation1 + $0x22] ss:$4 sm:$0xff] %v888_v14 }
 0x391   : > { %940 = vst [vmem:[#allocation1 + $0x23] ss:$4 sm:$0xff] %v889_v63 }
 0x392   : > { %942 = vst [vmem:[#allocation1] ss:$4 sm:$0xff] %v890_v32 }
 0x393   : > { %v855_v31 = vpop.f32.mrf.mxu3 }
 0x394   : > { %v891_v37 = vrot.slane %v855_v31, 2  ;;  %v892_v49 = vrot.slane %v855_v31, 4  ;;  %943 = vst [vmem:[#allocation1 + $0x1] ss:$4 sm:$0xff] %v855_v31  ;;  %v893_v38 = vrot.slane %v855_v31, 6 }
 0x396   : > { %944 = vst [vmem:[#allocation1 + $0x2] ss:$4 sm:$0xff] %v891_v37  ;;  %v3892_v56 = vpop.permute.xlu2 %1571  ;;  %v1556_v47 = vpop.permute.xlu1 %1555 }
 0x397   : > { %1027 = vxpose.xlu0.b32.end [3/3] (short) (narrow) %v936_v55, 16  ;;  %945 = vst [vmem:[#allocation1 + $0x3] ss:$4 sm:$0xff] %v892_v49  ;;  %v1580_v0 = vmul.f32 %v1556_v47, %v3655_v26  ;;  %v1581_v5 = vmul.f32 %v1556_v47, %v3878_v15 }
 0x398   : > { %v941_v18 = vld.sshfl [vmem:[#allocation1 + $0x20] sm:$0xff pattern:$0x73625140] }
 0x399   : > { %1057 = vxpose.xlu1.b32.start [1/3] (short) (narrow) %v941_v18, 16  ;;  %946 = vst [vmem:[#allocation1 + $0x20] ss:$4 sm:$0xff] %v893_v38 }
 0x39e   : > { %v947_v48 = vld.sshfl [vmem:[#allocation1] sm:$0xff pattern:$0x73625140]  ;;  %v3896_v60 = vpop.permute.xlu2 %1667  ;;  %v3904_v63 = vpop.permute.xlu1 %1563 }
 0x3a0   : > { %v948_v50 = vld.sshfl [vmem:[#allocation1 + $0x20] sm:$0xff pattern:$0x73625140] }
 0x3a1   : > { %1058 = vxpose.xlu1.b32.cont [2/3] (short) (narrow) %v947_v48, 16  ;;  %v3168_v48 = vmov 6  }
 0x3a6   : > { %v3900_v46 = vpop.permute.xlu2 %1691  ;;  %v3911_v32 = vpop.permute.xlu1 %1675 }
 0x3a9   : > { %1059 = vxpose.xlu1.b32.end [3/3] (short) (narrow) %v948_v50, 16 }
 0x3ae   : > { %v3902_v14 = vpop.permute.xlu2 %1663  ;;  %v3916_v37 = vpop.permute.xlu1 %1671 }
 0x3b6   : > { %v3906_v20 = vpop.permute.xlu2 %1892  ;;  %v3921_v38 = vpop.permute.xlu1 %1679 }
 0x3be   : > { %v3908_v55 = vpop.permute.xlu2 %1916  ;;  %v3932_v2 = vpop.permute.xlu1 %1900 }
 0x3c6   : > { %v3914_v31 = vpop.permute.xlu2 %1908  ;;  %v3944_v47 = vpop.permute.xlu1 %1896 }
 0x3e6   : > { %2839 = vset.pattern.permute.xlu2 %v3167_v22 }
 0x3ed   : > { %2012 = vperm.xlu2 %2839, %v3600_v57  }
 0x3f2   : > { %v3919_v49 = vpop.trf.xlu2 }
 0x3f3   : > { %v1393_v18 = vmul.f32 %v3836_v59, %v3919_v49  ;;  %v1313_v50 = vmul.f32 %v3762_v13, %v3919_v49  ;;  %v1615_v59 = vrot.slane %v1580_v0, 1 }
 0x3f5   : > { %2024 = vperm.xlu2 %2839, %v3608_v61  }
 0x3fa   : > { %v3934_v40 = vpop.trf.xlu2 }
 0x3fc   : > { %2841 = vset.pattern.permute.xlu1 %v3168_v48 }
 0x3fd   : > { %1413 = vrot.lane.b32.xlu2 %v1393_v18, %s3163_s23  ;;  %v1616_v18 = vrot.slane %v1581_v5, 1  ;;  %v1578_v5 = vmul.f32 %v1552_v41, %v3642_v17 }
 0x3fe   : > { %2840 = vset.pattern.permute.xlu0 %v3167_v22 }
 0x3ff   : > { %v1617_v13 = vsel %vm1501_vm4, %v1615_v59, %v1616_v18  ;;  %v1579_v59 = vmul.f32 %v1552_v41, %v3851_v4 }
 0x403   : > { %1333 = vrot.lane.b32.xlu1 %v1313_v50, %s3161_s3 }
 0x405   : > { %2036 = vperm.xlu0 %2840, %v3571_v36   ;;  %2008 = vperm.xlu2 %2839, %v3592_v53  }
 0x40b   : > { %1795 = vperm.xlu1 %2841, %v3602_v58   ;;  %v3952_v58 = vpop.permute.xlu1 %2020 }
 0x40d   : > { %1636 = vrot.lane.b32.xlu0 %v1617_v13, %s3161_s3  ;;  %v3941_v22 = vpop.trf.xlu2  ;;  %2842 = vset.pattern.permute.xlu2 %v3168_v48 }
 0x40e   : > { %1807 = vperm.xlu2 %2842, %v3615_v1   ;;  %2843 = vset.pattern.permute.xlu0 %v3168_v48  ;;  %v1394_v50 = vmul.f32 %v3738_v7, %v3941_v22  ;;  %v1314_v0 = vmul.f32 %v3663_v30, %v3941_v22  ;;  %v1612_v1 = vrot.slane %v1578_v5, 1  ;;  %v1613_v48 = vrot.slane %v1579_v59, 1 }
 0x410   : > { %v1614_v18 = vsel %vm1501_vm4, %v1612_v1, %v1613_v48 }
 0x413   : > { %1415 = vrot.lane.b32.xlu1 %v1394_v50, %s3163_s23  ;;  %v3958_v7 = vpop.permute.xlu1 %2032 }
 0x415   : > { %1335 = vrot.lane.b32.xlu0 %v1314_v0, %s3161_s3 }
 0x41b   : > { %1811 = vperm.xlu1 %2841, %v3571_v36   ;;  %v3967_v0 = vpop.permute.xlu1 %2016 }
 0x423   : > { %1634 = vrot.lane.b32.xlu1 %v1614_v18, %s3161_s3  ;;  %v3981_v59 = vpop.permute.xlu1 %2028 }
 0x42b   : > { %v3961_v13 = vpop.trf.xlu0 }
 0x42c   : > { %v1315_v30 = vmul.f32 %v3768_v34, %v3961_v13  ;;  %v1395_v50 = vmul.f32 %v3770_v35, %v3961_v13  ;;  %v1586_v36 = vmul.f32 %v3764_v29, %v3961_v13  ;;  %v1576_v34 = vmul.f32 %v3760_v28, %v3677_v39 }
 0x42d   : > { %v1577_v35 = vmul.f32 %v3760_v28, %v3773_v11  ;;  %v3992_v28 = vpop.trf.xlu2 }
 0x42e   : > { %1337 = vrot.lane.b32.xlu2 %v1315_v30, %s3161_s3  ;;  %1417 = vrot.lane.b32.xlu0 %v1395_v50, %s3163_s23  ;;  %v1624_v1 = vrot.slane %v1586_v36, 1  ;;  %v1609_v30 = vrot.slane %v1576_v34, 1 }
 0x42f   : > { %v1610_v50 = vrot.slane %v1577_v35, 1  ;;  %v4554_v35 = vmov 0  }
 0x431   : > { %v1611_v27 = vsel %vm1501_vm4, %v1609_v30, %v1610_v50 }
 0x433   : > { %v3973_v41 = vpop.trf.xlu0 }
 0x434   : > { %v1587_v5 = vmul.f32 %v3764_v29, %v3973_v41  ;;  %v1707_v50 = vmul.f32 %v3778_v44, %v3973_v41 }
 0x436   : > { %1791 = vperm.xlu2 %2842, %v3560_v24   ;;  %1787 = vperm.xlu0 %2843, %v3600_v57   ;;  %v1625_v48 = vrot.slane %v1587_v5, 1  ;;  %v1700_v5 = vmul.f32 %v3911_v32, %v3655_v26 }
 0x438   : > { %v1626_v18 = vsel %vm1501_vm4, %v1624_v1, %v1625_v48  ;;  %v1585_v48 = vmul.f32 %v3904_v63, %v3992_v28 }
 0x439   : > { %1642 = vrot.lane.b32.xlu1 %v1626_v18, %s3161_s3  ;;  %v1735_v18 = vrot.slane %v1700_v5, 1  ;;  %v1583_v5 = vmul.f32 %v3890_v3, %v3934_v40 }
 0x43d   : > { %v3987_v29 = vpop.trf.xlu1 }
 0x43e   : > { %1632 = vrot.lane.b32.xlu2 %v1611_v27, %s3161_s3  ;;  %1803 = vperm.xlu0 %2843, %v3610_v62   ;;  %v1316_v24 = vmul.f32 %v3670_v33, %v3987_v29  ;;  %v1396_v57 = vmul.f32 %v3848_v8, %v3987_v29  ;;  %v1588_v36 = vmul.f32 %v3892_v56, %v3987_v29 }
 0x43f   : > { %v1701_v27 = vmul.f32 %v3911_v32, %v3878_v15 }
 0x440   : > { %v1627_v8 = vrot.slane %v1588_v36, 1 }
 0x441   : > { %1339 = vrot.lane.b32.xlu1 %v1316_v24, %s3161_s3  ;;  %v1736_v30 = vrot.slane %v1701_v27, 1  ;;  %v1706_v24 = vmul.f32 %v3778_v44, %v3961_v13  ;;  %v1575_v44 = vmul.f32 %v3898_v42, %v3866_v45 }
 0x443   : > { %v1737_v36 = vsel %vm1501_vm4, %v1735_v18, %v1736_v30  ;;  %v1619_v18 = vrot.slane %v1583_v5, 1  ;;  %v1696_v30 = vmul.f32 %v3896_v60, %v3677_v39 }
 0x445   : > { %v4005_v62 = vpop.trf.xlu1 }
 0x446   : > { %1419 = vrot.lane.b32.xlu2 %v1396_v57, %s3163_s23  ;;  %v1589_v33 = vmul.f32 %v3892_v56, %v4005_v62  ;;  %2845 = vset.pattern.permute.xlu0 %v4554_v35  ;;  %v1584_v56 = vmul.f32 %v3904_v63, %v3941_v22  ;;  %v1622_v57 = vrot.slane %v1585_v48, 1  ;;  %v1582_v63 = vmul.f32 %v3890_v3, %v3919_v49 }
 0x447   : > { %v4010_v34 = vpop.permute.xlu2 %2012 }
 0x448   : > { %v1628_v1 = vrot.slane %v1589_v33, 1  ;;  %v1621_v27 = vrot.slane %v1584_v56, 1  ;;  %v1607_v56 = vrot.slane %v1575_v44, 1 }
 0x449   : > { %1799 = vperm.xlu1 %2841, %v3608_v61   ;;  %v1745_v61 = vrot.slane %v1707_v50, 1  ;;  %v1618_v50 = vrot.slane %v1582_v63, 1  ;;  %v1708_v63 = vmul.f32 %v3900_v46, %v3987_v29 }
 0x44a   : > { %v1629_v32 = vsel %vm1501_vm4, %v1627_v8, %v1628_v1  ;;  %v1574_v8 = vmul.f32 %v3898_v42, %v3648_v21  ;;  %v1744_v1 = vrot.slane %v1706_v24, 1  ;;  %v1623_v48 = vsel %vm1501_vm4, %v1621_v27, %v1622_v57 }
 0x44b   : > { %1644 = vrot.lane.b32.xlu0 %v1629_v32, %s3161_s3  ;;  %v1697_v32 = vmul.f32 %v3896_v60, %v3773_v11  ;;  %v1620_v24 = vsel %vm1501_vm4, %v1618_v50, %v1619_v18  ;;  %v1729_v57 = vrot.slane %v1696_v30, 1  ;;  %v1709_v60 = vmul.f32 %v3900_v46, %v4005_v62 }
 0x44c   : > { %v1746_v3 = vsel %vm1501_vm4, %v1744_v1, %v1745_v61  ;;  %v1606_v42 = vrot.slane %v1574_v8, 1  ;;  %v1703_v61 = vmul.f32 %v3921_v38, %v3934_v40  ;;  %v1702_v8 = vmul.f32 %v3921_v38, %v3919_v49 }
 0x44d   : > { %v1748_v44 = vrot.slane %v1709_v60, 1  ;;  %v1698_v1 = vmul.f32 %v3916_v37, %v3642_v17  ;;  %v1747_v30 = vrot.slane %v1708_v63, 1  ;;  %v1694_v46 = vmul.f32 %v3902_v14, %v3648_v21 }
 0x44e   : > { %1756 = vrot.lane.b32.xlu2 %v1737_v36, %s3163_s23  ;;  %v1730_v36 = vrot.slane %v1697_v32, 1  ;;  %v1608_v27 = vsel %vm1501_vm4, %v1606_v42, %v1607_v56  ;;  %v1739_v18 = vrot.slane %v1703_v61, 1  ;;  %v1738_v38 = vrot.slane %v1702_v8, 1 }
 0x44f   : > { %v4028_v33 = vpop.permute.xlu2 %2024  ;;  %v1749_v50 = vsel %vm1501_vm4, %v1747_v30, %v1748_v44  ;;  %v1732_v42 = vrot.slane %v1698_v1, 1  ;;  %v1704_v61 = vmul.f32 %v3784_v19, %v3941_v22  ;;  %v1922_v63 = vmul.f32 %v3906_v20, %v3773_v11 }
 0x450   : > { %v1924_v30 = vmul.f32 %v3944_v47, %v3851_v4 }
 0x451   : > { %1640 = vrot.lane.b32.xlu1 %v1623_v48, %s3161_s3  ;;  %v1699_v48 = vmul.f32 %v3916_v37, %v3851_v4  ;;  %v1926_v37 = vmul.f32 %v3932_v2, %v3878_v15 }
 0x452   : > { %2844 = vset.pattern.permute.xlu1 %v4554_v35  ;;  %v1731_v35 = vsel %vm1501_vm4, %v1729_v57, %v1730_v36  ;;  %v1726_v57 = vrot.slane %v1694_v46, 1 }
 0x453   : > { %1762 = vrot.lane.b32.xlu0 %v1746_v3, %s3163_s23  ;;  %v1695_v3 = vmul.f32 %v3902_v14, %v3866_v45  ;;  %v1733_v56 = vrot.slane %v1699_v48, 1 }
 0x455   : > { %v1727_v36 = vrot.slane %v1695_v3, 1  ;;  %v1734_v14 = vsel %vm1501_vm4, %v1732_v42, %v1733_v56  ;;  %v1955_v42 = vrot.slane %v1922_v63, 2 }
 0x456   : > { %1638 = vrot.lane.b32.xlu2 %v1620_v24, %s3161_s3  ;;  %v1740_v24 = vsel %vm1501_vm4, %v1738_v38, %v1739_v18  ;;  %v1741_v38 = vrot.slane %v1704_v61, 1  ;;  %v1928_v61 = vmul.f32 %v3801_v23, %v3934_v40 }
 0x457   : > { %v4047_v5 = vpop.permute.xlu2 %1413  ;;  %v1728_v8 = vsel %vm1501_vm4, %v1726_v57, %v1727_v36  ;;  %v1958_v57 = vrot.slane %v1924_v30, 2  ;;  %v2045_v36 = vmul.f32 %v3952_v58, %v3655_v26 }
 0x459   : > { %1630 = vrot.lane.b32.xlu1 %v1608_v27, %s3161_s3  ;;  %v1705_v27 = vmul.f32 %v3784_v19, %v3992_v28  ;;  %v1923_v19 = vmul.f32 %v3944_v47, %v3642_v17  ;;  %v1931_v47 = vmul.f32 %v3792_v51, %v3961_v13 }
 0x45b   : > { %1752 = vrot.lane.b32.xlu0 %v1731_v35, %s3163_s23  ;;  %v1961_v35 = vrot.slane %v1926_v37, 2  ;;  %v1742_v18 = vrot.slane %v1705_v27, 1 }
 0x45d   : > { %v1743_v56 = vsel %vm1501_vm4, %v1741_v38, %v1742_v18 }
 0x45e   : > { %1783 = vperm.xlu2 %2842, %v3592_v53   ;;  %v1925_v53 = vmul.f32 %v3932_v2, %v3655_v26  ;;  %v1921_v2 = vmul.f32 %v3906_v20, %v3677_v39 }
 0x45f   : > { %v4066_v32 = vpop.permute.xlu2 %2008 }
 0x460   : > { %v1960_v60 = vrot.slane %v1925_v53, 2  ;;  %v1932_v53 = vmul.f32 %v3792_v51, %v3973_v41  ;;  %v2080_v51 = vrot.slane %v2045_v36, 2 }
 0x461   : > { %1764 = vrot.lane.b32.xlu1 %v1749_v50, %s3163_s23  ;;  %v1954_v50 = vrot.slane %v1921_v2, 2  ;;  %v1969_v2 = vrot.slane %v1931_v47, 2  ;;  %v1930_v47 = vmul.f32 %v3914_v31, %v3992_v28 }
 0x462   : > { %v1962_v46 = vsel %vm1846_vm5, %v1960_v60, %v1961_v35  ;;  %v1970_v60 = vrot.slane %v1932_v53, 2 }
 0x463   : > { %1758 = vrot.lane.b32.xlu0 %v1740_v24, %s3163_s23  ;;  %v1957_v24 = vrot.slane %v1923_v19, 2  ;;  %v1956_v27 = vsel %vm1846_vm5, %v1954_v50, %v1955_v42  ;;  %v1964_v19 = vrot.slane %v1928_v61, 2  ;;  %v1919_v50 = vmul.f32 %v3804_v25, %v3648_v21 }
 0x464   : > { %v1920_v42 = vmul.f32 %v3804_v25, %v3866_v45 }
 0x465   : > { %v1959_v35 = vsel %vm1846_vm5, %v1957_v24, %v1958_v57  ;;  %v1951_v36 = vrot.slane %v1919_v50, 2 }
 0x466   : > { %1754 = vrot.lane.b32.xlu2 %v1734_v14, %s3163_s23  ;;  %v2046_v14 = vmul.f32 %v3952_v58, %v3878_v15  ;;  %v1927_v58 = vmul.f32 %v3801_v23, %v3919_v49 }
 0x468   : > { %v1808_v44 = vpop.permute.xlu2 %1807  ;;  %v2081_v63 = vrot.slane %v2046_v14, 2  ;;  %v1952_v14 = vrot.slane %v1920_v42, 2 }
 0x469   : > { %1750 = vrot.lane.b32.xlu1 %v1728_v8, %s3163_s23  ;;  %v1826_v1 = vmul.f32 %v1808_v44, %v3961_v13  ;;  %v1827_v48 = vmul.f32 %v1808_v44, %v3973_v41  ;;  %v1265_v8 = vmul.f32 %v3705_v52, %v3919_v49  ;;  %v1963_v52 = vrot.slane %v1927_v58, 2 }
 0x46a   : > { %v2082_v23 = vsel %vm1846_vm5, %v2080_v51, %v2081_v63  ;;  %v1967_v51 = vrot.slane %v1930_v47, 2 }
 0x46b   : > { %1981 = vrot.lane.b32.xlu0 %v1962_v46, %s3161_s3  ;;  %v1865_v20 = vrot.slane %v1826_v1, 2  ;;  %v1866_v3 = vrot.slane %v1827_v48, 2  ;;  %v1971_v1 = vsel %vm1846_vm5, %v1969_v2, %v1970_v60  ;;  %v1934_v48 = vmul.f32 %v3908_v55, %v4005_v62 }
 0x46c   : > { %v1933_v46 = vmul.f32 %v3908_v55, %v3987_v29  ;;  %v1965_v55 = vsel %vm1846_vm5, %v1963_v52, %v1964_v19  ;;  %v2043_v60 = vmul.f32 %v3967_v0, %v3642_v17 }
 0x46d   : > { %v4104_v37 = vsel %vm1846_vm5, %v1865_v20, %v1866_v3  ;;  %v2052_v3 = vmul.f32 %v3958_v7, %v3973_v41  ;;  %v1973_v38 = vrot.slane %v1934_v48, 2 }
 0x46e   : > { %1760 = vrot.lane.b32.xlu2 %v1743_v56, %s3163_s23  ;;  %v1972_v56 = vrot.slane %v1933_v46, 2 }
 0x46f   : > { %v2090_v53 = vrot.slane %v2052_v3, 2 }
 0x470   : > { %v1974_v57 = vsel %vm1846_vm5, %v1972_v56, %v1973_v38  ;;  %v2049_v56 = vmul.f32 %v3981_v59, %v3941_v22 }
 0x471   : > { %1977 = vrot.lane.b32.xlu1 %v1956_v27, %s3161_s3 }
 0x473   : > { %1979 = vrot.lane.b32.xlu0 %v1959_v35, %s3161_s3  ;;  %v2044_v35 = vmul.f32 %v3967_v0, %v3851_v4  ;;  %v2042_v0 = vmul.f32 %v4010_v34, %v3773_v11 }
 0x475   : > { %v1334_v44 = vpop.permute.xlu1 %1333 }
 0x476   : > { %v1353_v18 = vadd.f32 %v1334_v44, %v1265_v8  ;;  %1987 = vrot.lane.b32.xlu2 %v1971_v1, %s3161_s3  ;;  %v2077_v44 = vrot.slane %v2043_v60, 2  ;;  %v2078_v1 = vrot.slane %v2044_v35, 2 }
 0x477   : > { %v2037_v30 = vpop.permute.xlu0 %2036 }
 0x478   : > { %v4130_v20 = vadd.f32 %v4047_v5, %v1353_v18  ;;  %v2051_v5 = vmul.f32 %v3958_v7, %v3961_v13  ;;  %v1929_v7 = vmul.f32 %v3914_v31, %v3941_v22  ;;  %v2053_v63 = vmul.f32 %v2037_v30, %v3987_v29 }
 0x479   : > { %2101 = vrot.lane.b32.xlu1 %v2082_v23, %s3163_s23  ;;  %v2054_v8 = vmul.f32 %v2037_v30, %v4005_v62  ;;  %v1953_v31 = vsel %vm1846_vm5, %v1951_v36, %v1952_v14  ;;  %v1266_v30 = vmul.f32 %v3639_v16, %v3941_v22  ;;  %v1267_v23 = vmul.f32 %v3709_v54, %v3961_v13 }
 0x47a   : > { %v2089_v25 = vrot.slane %v2051_v5, 2  ;;  %v1966_v58 = vrot.slane %v1929_v7, 2  ;;  %v2092_v19 = vrot.slane %v2053_v63, 2  ;;  %v2079_v50 = vsel %vm1846_vm5, %v2077_v44, %v2078_v1 }
 0x47b   : > { %1983 = vrot.lane.b32.xlu0 %v1965_v55, %s3161_s3  ;;  %v2093_v46 = vrot.slane %v2054_v8, 2  ;;  %v2075_v55 = vrot.slane %v2042_v0, 2  ;;  %v2039_v16 = vmul.f32 %v4066_v32, %v3648_v21  ;;  %v2040_v54 = vmul.f32 %v4066_v32, %v3866_v45 }
 0x47c   : > { %v2091_v2 = vsel %vm1846_vm5, %v2089_v25, %v2090_v53  ;;  %v1968_v18 = vsel %vm1846_vm5, %v1966_v58, %v1967_v51  ;;  %v2047_v36 = vmul.f32 %v4028_v33, %v3919_v49  ;;  %v2048_v14 = vmul.f32 %v4028_v33, %v3934_v40 }
 0x47d   : > { %v4144_v24 = vpop.permute.xlu1 %1795  ;;  %v2094_v53 = vsel %vm1846_vm5, %v2092_v19, %v2093_v46  ;;  %v2072_v7 = vrot.slane %v2040_v54, 2  ;;  %v2086_v32 = vrot.slane %v2049_v56, 2  ;;  %v1482_v1 = vmul.f32 %v3758_v10, %v3973_v41 }
 0x47e   : > { %1989 = vrot.lane.b32.xlu2 %v1974_v57, %s3161_s3  ;;  %v2084_v51 = vrot.slane %v2048_v14, 2 }
 0x47f   : > { %v1637_v27 = vpop.permute.xlu0 %1636  ;;  %v1521_v0 = vrot.slane %v1482_v1, 1 }
 0x480   : > { %v4157_v61 = vadd.f32 %v1637_v27, %v3884_v6  ;;  %v2041_v6 = vmul.f32 %v4010_v34, %v3677_v39  ;;  %v2050_v34 = vmul.f32 %v3981_v59, %v3992_v28  ;;  %v2071_v27 = vrot.slane %v2039_v16, 2 }
 0x481   : > { %2107 = vrot.lane.b32.xlu1 %v2091_v2, %s3163_s23  ;;  %v2083_v2 = vrot.slane %v2047_v36, 2 }
 0x482   : > { %v2074_v42 = vrot.slane %v2041_v6, 2  ;;  %v2087_v47 = vrot.slane %v2050_v34, 2  ;;  %v2073_v63 = vsel %vm1846_vm5, %v2071_v27, %v2072_v7  ;;  %v1481_v6 = vmul.f32 %v3758_v10, %v3961_v13 }
 0x483   : > { %1975 = vrot.lane.b32.xlu0 %v1953_v31, %s3161_s3  ;;  %v2085_v8 = vsel %vm1846_vm5, %v2083_v2, %v2084_v51 }
 0x484   : > { %v2076_v25 = vsel %vm1846_vm5, %v2074_v42, %v2075_v55  ;;  %v2088_v35 = vsel %vm1846_vm5, %v2086_v32, %v2087_v47  ;;  %v1520_v19 = vrot.slane %v1481_v6, 1  ;;  %v4555_v47 = vld [vmem:[#allocation34_spill] sm:$0xff] }
 0x485   : > { %v1416_v48 = vpop.permute.xlu1 %1415  ;;  %v1480_v36 = vmul.f32 %v4555_v47, %v3992_v28 }
 0x486   : > { %1985 = vrot.lane.b32.xlu2 %v1968_v18, %s3161_s3  ;;  %s2986_s3 = scalar_lea.hbm %s4563_s1, 128 }
 0x487   : > { %v1336_v52 = vpop.permute.xlu0 %1335  ;;  %v1518_v32 = vrot.slane %v1480_v36, 1 }
 0x488   : > { %v1354_v3 = vadd.f32 %v1336_v52, %v1266_v30  ;;  %v1338_v38 = vpop.permute.xlu2 %1337  ;;  %v1821_v30 = vmul.f32 %v4144_v24, %v3878_v15 }
 0x489   : > { %v1355_v5 = vadd.f32 %v1338_v38, %v1267_v23  ;;  %2099 = vrot.lane.b32.xlu1 %v2079_v50, %s3163_s23 }
 0x48a   : > { %v4186_v57 = vadd.f32 %v1416_v48, %v1354_v3  ;;  %v1857_v3 = vrot.slane %v1821_v30, 2 }
 0x48b   : > { %2109 = vrot.lane.b32.xlu0 %v2094_v53, %s3163_s23 }
 0x48d   : > { %v4193_v59 = vpop.permute.xlu1 %1811 }
 0x48e   : > { %2097 = vrot.lane.b32.xlu2 %v2076_v25, %s3163_s23 }
 0x490   : > { %v1792_v60 = vpop.permute.xlu2 %1791 }
 0x491   : > { %2105 = vrot.lane.b32.xlu1 %v2088_v35, %s3163_s23  ;;  %v1818_v54 = vmul.f32 %v1792_v60, %v3642_v17 }
 0x493   : > { %2095 = vrot.lane.b32.xlu0 %v2073_v63, %s3163_s23  ;;  %v1853_v25 = vrot.slane %v1818_v54, 2 }
 0x495   : > { %v1635_v33 = vpop.permute.xlu1 %1634 }
 0x496   : > { %v1656_v31 = vadd.f32 %v1635_v33, %v3860_v43  ;;  %2103 = vrot.lane.b32.xlu2 %v2085_v8, %s3163_s23  ;;  %v1820_v43 = vmul.f32 %v4144_v24, %v3655_v26  ;;  %v1268_v26 = vmul.f32 %v3634_v12, %v3987_v29  ;;  %v1479_v12 = vmul.f32 %v4555_v47, %v3941_v22  ;;  %v4556_v8 = vld [vmem:[#allocation33_spill] sm:$0xff]  ;;  %s4560_s23 = sld [smem:[#allocation42_spill]] }
 0x498   : > { %v1633_v58 = vpop.permute.xlu2 %1632  ;;  %v1856_v23 = vrot.slane %v1820_v43, 2  ;;  %v1517_v51 = vrot.slane %v1479_v12, 1 }
 0x499   : > { %v4205_v44 = vadd.f32 %v1633_v58, %v3781_v9  ;;  %v1522_v9 = vsel %vm1501_vm4, %v1520_v19, %v1521_v0  ;;  %v1484_v58 = vmul.f32 %v4556_v8, %v4005_v62 }
 0x49a   : > { %v1858_v13 = vsel %vm1846_vm5, %v1856_v23, %v1857_v3  ;;  %v1519_v33 = vsel %vm1501_vm4, %v1517_v51, %v1518_v32 }
 0x49b   : > { %v1539_v6 = vadd.f32 %v1519_v33, %v4186_v57  ;;  %v1524_v30 = vrot.slane %v1484_v58, 1 }
 0x4a0   : > { %v1418_v48 = vpop.permute.xlu0 %1417  ;;  %v1420_v18 = vpop.permute.xlu2 %1419 }
 0x4a1   : > { %v1435_v46 = vadd.f32 %v1418_v48, %v1355_v5 }
 0x4a3   : > { %v1540_v52 = vadd.f32 %v1522_v9, %v1435_v46 }
 0x4a8   : > { %v1757_v41 = vpop.permute.xlu2 %1756  ;;  %v1788_v38 = vpop.permute.xlu0 %1787 }
 0x4a9   : > { %v1777_v10 = vadd.f32 %v1757_v41, %v4157_v61  ;;  %v1819_v61 = vmul.f32 %v1792_v60, %v3851_v4 }
 0x4ab   : > { %v1643_v50 = vpop.permute.xlu1 %1642  ;;  %v4218_v34 = vadd.f32 %v1858_v13, %v1777_v10  ;;  %v1854_v27 = vrot.slane %v1819_v61, 2 }
 0x4ac   : > { %v1660_v42 = vadd.f32 %v1643_v50, %v1540_v52 }
 0x4ad   : > { %v1855_v4 = vsel %vm1846_vm5, %v1853_v25, %v1854_v27  ;;  %v4557_v27 = vld [vmem:[#allocation32_spill] sm:$0xff] }
 0x4b0   : > { %v4220_v55 = vpop.permute.xlu2 %1638  ;;  %v1804_v15 = vpop.permute.xlu0 %1803 }
 0x4b1   : > { %v1824_v2 = vmul.f32 %v1804_v15, %v3941_v22  ;;  %v1825_v17 = vmul.f32 %v1804_v15, %v3992_v28  ;;  %v1816_v22 = vmul.f32 %v1788_v38, %v3677_v39  ;;  %v1817_v28 = vmul.f32 %v1788_v38, %v3773_v11 }
 0x4b2   : > { %v1828_v39 = vmul.f32 %v4193_v59, %v3987_v29  ;;  %v1829_v11 = vmul.f32 %v4193_v59, %v4005_v62 }
 0x4b3   : > { %v1340_v24 = vpop.permute.xlu1 %1339  ;;  %v1862_v0 = vrot.slane %v1824_v2, 2  ;;  %v1850_v23 = vrot.slane %v1816_v22, 2  ;;  %v1851_v57 = vrot.slane %v1817_v28, 2 }
 0x4b4   : > { %v1356_v5 = vadd.f32 %v1340_v24, %v1268_v26  ;;  %v1868_v24 = vrot.slane %v1828_v39, 2 }
 0x4b6   : > { %v1436_v56 = vadd.f32 %v1420_v18, %v1356_v5  ;;  %v1483_v18 = vmul.f32 %v4556_v8, %v3987_v29  ;;  %v1869_v5 = vrot.slane %v1829_v11, 2 }
 0x4b8   : > { %v4224_v16 = vpop.permute.xlu2 %1783  ;;  %v1523_v3 = vrot.slane %v1483_v18, 1  ;;  %v1870_v29 = vsel %vm1846_vm5, %v1868_v24, %v1869_v5  ;;  %v3169_v24 = vmov 1983009808  }
 0x4b9   : > { %v2134_v5 = vunpack.c.l.s4 %v3169_v24 }
 0x4ba   : > { %v1525_v38 = vsel %vm1501_vm4, %v1523_v3, %v1524_v30 }
 0x4bb   : > { %v4228_v53 = vpop.permute.xlu1 %1799  ;;  %v1541_v13 = vadd.f32 %v1525_v38, %v1436_v56  ;;  %v1478_v56 = vmul.f32 %v4557_v27, %v3934_v40 }
 0x4bc   : > { %v1823_v51 = vmul.f32 %v4228_v53, %v3934_v40 }
 0x4bd   : > { %v1645_v14 = vpop.permute.xlu0 %1644 }
 0x4be   : > { %v1661_v54 = vadd.f32 %v1645_v14, %v1541_v13  ;;  %v1815_v13 = vmul.f32 %v4224_v16, %v3866_v45 }
 0x4c0   : > { %v1755_v7 = vpop.permute.xlu2 %1754 }
 0x4c1   : > { %v1776_v35 = vadd.f32 %v1755_v7, %v1656_v31  ;;  %v1863_v31 = vrot.slane %v1825_v17, 2  ;;  %v1515_v7 = vrot.slane %v1478_v56, 1  ;;  %v1822_v17 = vmul.f32 %v4228_v53, %v3919_v49 }
 0x4c3   : > { %v1641_v60 = vpop.permute.xlu1 %1640  ;;  %v4237_v63 = vadd.f32 %v1855_v4, %v1776_v35  ;;  %v1864_v52 = vsel %vm1846_vm5, %v1862_v0, %v1863_v31  ;;  %v1859_v58 = vrot.slane %v1822_v17, 2 }
 0x4c4   : > { %v1659_v19 = vadd.f32 %v1641_v60, %v1539_v6 }
 0x4c5   : > { %v1763_v1 = vpop.permute.xlu0 %1762 }
 0x4c6   : > { %v1780_v48 = vadd.f32 %v1763_v1, %v1660_v42  ;;  %v1852_v42 = vsel %vm1846_vm5, %v1850_v23, %v1851_v57  ;;  %v1860_v1 = vrot.slane %v1823_v51, 2 }
 0x4c8   : > { %v1761_v46 = vpop.permute.xlu2 %1760  ;;  %v1885_v43 = vadd.f32 %v4104_v37, %v1780_v48 }
 0x4c9   : > { %v1779_v9 = vadd.f32 %v1761_v46, %v1659_v19 }
 0x4cb   : > { %v4249_v41 = vpop.permute.xlu1 %1630  ;;  %v4251_v10 = vadd.f32 %v1864_v52, %v1779_v9 }
 0x4cd   : > { %v1753_v37 = vpop.permute.xlu0 %1752 }
 0x4ce   : > { %v1775_v50 = vadd.f32 %v1753_v37, %v4205_v44  ;;  %v1477_v44 = vmul.f32 %v4557_v27, %v3919_v49  ;;  %v1861_v49 = vsel %vm1846_vm5, %v1859_v58, %v1860_v1  ;;  %v1814_v37 = vmul.f32 %v4224_v16, %v3648_v21 }
 0x4cf   : > { %v4285_v27 = vunpack.c.0.s8 %v2134_v5 }
 0x4d0   : > { %v1988_v26 = vpop.permute.xlu2 %1987  ;;  %v1880_v15 = vadd.f32 %v1852_v42, %v1775_v50  ;;  %v1514_v35 = vrot.slane %v1477_v44, 1  ;;  %v4558_v42 = vld [vmem:[#allocation31_spill] sm:$0xff]  ;;  %v3170_v44 = vmov 1934713408  }
 0x4d1   : > { %v2005_v52 = vadd.f32 %v1988_v26, %v1885_v43  ;;  %v1847_v43 = vrot.slane %v1814_v37, 2  ;;  %v1848_v26 = vrot.slane %v1815_v13, 2 }
 0x4d2   : > { %v1516_v14 = vsel %vm1501_vm4, %v1514_v35, %v1515_v7  ;;  %v2182_v7 = vunpack.c.l.s4 %v3170_v44 }
 0x4d3   : > { %v1765_v61 = vpop.permute.xlu1 %1764  ;;  %v1538_v4 = vadd.f32 %v1516_v14, %v4130_v20  ;;  %v1849_v21 = vsel %vm1846_vm5, %v1847_v43, %v1848_v26 }
 0x4d4   : > { %v1781_v47 = vadd.f32 %v1765_v61, %v1661_v54 }
 0x4d5   : > { %v1759_v36 = vpop.permute.xlu0 %1758  ;;  %v1658_v33 = vadd.f32 %v4220_v55, %v1538_v4 }
 0x4d6   : > { %v1886_v25 = vadd.f32 %v1870_v29, %v1781_v47 }
 0x4d7   : > { %v1778_v0 = vadd.f32 %v1759_v36, %v1658_v33  ;;  %v4295_v33 = vunpack.c.0.s8 %v2182_v7 }
 0x4d8   : > { %v1990_v62 = vpop.permute.xlu2 %1989 }
 0x4d9   : > { %v1883_v53 = vadd.f32 %v1861_v49, %v1778_v0  ;;  %v2006_v61 = vadd.f32 %v1990_v62, %v1886_v25 }
 0x4db   : > { %v1751_v59 = vpop.permute.xlu1 %1750 }
 0x4dd   : > { %v1982_v12 = vpop.permute.xlu0 %1981 }
 0x4de   : > { %v2002_v48 = vadd.f32 %v1982_v12, %v4218_v34 }
 0x4e0   : > { %v1986_v32 = vpop.permute.xlu2 %1985 }
 0x4e1   : > { %v2004_v45 = vadd.f32 %v1986_v32, %v4251_v10 }
 0x4e3   : > { %v1978_v2 = vpop.permute.xlu1 %1977 }
 0x4e4   : > { %v2000_v8 = vadd.f32 %v1978_v2, %v1880_v15  ;;  %v1654_v15 = vadd.f32 %v4249_v41, %v4558_v42 }
 0x4e5   : > { %v1980_v60 = vpop.permute.xlu0 %1979 }
 0x4e6   : > { %v1774_v47 = vadd.f32 %v1751_v59, %v1654_v15  ;;  %v2001_v36 = vadd.f32 %v1980_v60, %v4237_v63 }
 0x4e8   : > { %v2098_v6 = vpop.permute.xlu2 %2097  ;;  %v1879_v16 = vadd.f32 %v1849_v21, %v1774_v47 }
 0x4e9   : > { %v2120_v31 = vadd.f32 %v2098_v6, %v2000_v8 }
 0x4eb   : > { %v2143_v22 = vrot.slane %v2120_v31, 4  ;;  %v2102_v28 = vpop.permute.xlu1 %2101 }
 0x4ec   : > { %v2122_v18 = vadd.f32 %v2102_v28, %v2002_v48 }
 0x4ed   : > { %v1984_v40 = vpop.permute.xlu0 %1983 }
 0x4ee   : > { %v2141_v20 = vrot.slane %v2122_v18, 4  ;;  %v2144_v19 = vsel %vm2129_vm6, %v2122_v18, %v2143_v22  ;;  %v2003_v55 = vadd.f32 %v1984_v40, %v1883_v53 }
 0x4ef   : > { %v2152_v63 = vperm.slane %v2144_v19, %v4285_v27 }
 0x4f0   : > { %v2142_v46 = vsel %vm2129_vm6, %v2141_v20, %v2120_v31  ;;  %v2104_v30 = vpop.permute.xlu2 %2103 }
 0x4f1   : > { %v2123_v9 = vadd.f32 %v2104_v30, %v2003_v55  ;;  %v2148_v35 = vperm.slane %v2142_v46, %v4285_v27  ;;  %v2189_v28 = vrot.slane %v2152_v63, 4 }
 0x4f3   : > { %v2155_v23 = vrot.slane %v2123_v9, 4  ;;  %v2108_v57 = vpop.permute.xlu1 %2107  ;;  %v2177_v8 = vrot.slane %v2148_v35, 4 }
 0x4f4   : > { %v2125_v34 = vadd.f32 %v2108_v57, %v2005_v52 }
 0x4f5   : > { %v1976_v3 = vpop.permute.xlu0 %1975 }
 0x4f6   : > { %v2153_v39 = vrot.slane %v2125_v34, 4  ;;  %v2156_v11 = vsel %vm2129_vm6, %v2125_v34, %v2155_v23  ;;  %v1999_v25 = vadd.f32 %v1976_v3, %v1879_v16 }
 0x4f7   : > { %v2164_v2 = vperm.slane %v2156_v11, %v4285_v27 }
 0x4f8   : > { %v2154_v38 = vsel %vm2129_vm6, %v2153_v39, %v2123_v9 }
 0x4f9   : > { %v2160_v41 = vperm.slane %v2154_v38, %v4285_v27  ;;  %v2215_v49 = vrot.slane %v2164_v2, 4 }
 0x4fb   : > { %v2100_v50 = vpop.permute.xlu1 %2099  ;;  %v2203_v4 = vrot.slane %v2160_v41, 4 }
 0x4fc   : > { %v2121_v56 = vadd.f32 %v2100_v50, %v2001_v36 }
 0x4fd   : > { %v2110_v54 = vpop.permute.xlu0 %2109 }
 0x4fe   : > { %v2126_v29 = vadd.f32 %v2110_v54, %v2006_v61  ;;  %v2128_v17 = vrot.slane %v2121_v56, 4 }
 0x500   : > { %v2165_v62 = vrot.slane %v2126_v29, 4 }
 0x503   : > { %v2106_v12 = vpop.permute.xlu1 %2105 }
 0x504   : > { %v2124_v59 = vadd.f32 %v2106_v12, %v2004_v45  ;;  %v2283_v12 = vld [vmem:[%s4559_s6] sm:$0xf] }
 0x505   : > { %v2096_v14 = vpop.permute.xlu0 %2095 }
 0x506   : > { %v2119_v51 = vadd.f32 %v2096_v14, %v1999_v25  ;;  %v2166_v10 = vsel %vm2129_vm6, %v2165_v62, %v2124_v59  ;;  %v2167_v32 = vrot.slane %v2124_v59, 4 }
 0x507   : > { %v2172_v60 = vperm.slane %v2166_v10, %v4285_v27 }
 0x508   : > { %v2130_v58 = vsel %vm2129_vm6, %v2128_v17, %v2119_v51  ;;  %v2131_v1 = vrot.slane %v2119_v51, 4  ;;  %v2168_v6 = vsel %vm2129_vm6, %v2126_v29, %v2167_v32 }
 0x509   : > { %v2136_v0 = vperm.slane %v2130_v58, %v4285_v27  ;;  %v2176_v31 = vperm.slane %v2168_v6, %v4285_v27  ;;  %v2201_v48 = vrot.slane %v2172_v60, 4  ;;  %v2204_v22 = vsel %vm2129_vm6, %v2172_v60, %v2203_v4  ;;  %v2127_v4 = vld [vmem:[%s4560_s23] sm:$0xf] }
 0x50a   : > { %v2132_v18 = vsel %vm2129_vm6, %v2121_v56, %v2131_v1  ;;  %v2212_v40 = vperm.slane %v2204_v22, %v4295_v33 }
 0x50b   : > { %v2140_v53 = vperm.slane %v2132_v18, %v4285_v27  ;;  %v2178_v20 = vsel %vm2129_vm6, %v2177_v8, %v2136_v0  ;;  %v2179_v19 = vrot.slane %v2136_v0, 4  ;;  %v2213_v55 = vrot.slane %v2176_v31, 4 }
 0x50c   : > { %v2229_v46 = vrot.slane %v2212_v40, 4  ;;  %v2184_v30 = vperm.slane %v2178_v20, %v4295_v33  ;;  %v2202_v9 = vsel %vm2129_vm6, %v2201_v48, %v2160_v41  ;;  %v2216_v52 = vsel %vm2129_vm6, %v2176_v31, %v2215_v49 }
 0x50d   : > { %v2191_v23 = vrot.slane %v2140_v53, 4  ;;  %v2180_v57 = vsel %vm2129_vm6, %v2148_v35, %v2179_v19  ;;  %v2208_v34 = vperm.slane %v2202_v9, %v4295_v33  ;;  %v2224_v3 = vperm.slane %v2216_v52, %v4295_v33 }
 0x50e   : > { %v2188_v39 = vperm.slane %v2180_v57, %v4295_v33  ;;  %v2227_v11 = vrot.slane %v2184_v30, 4  ;;  %v2190_v38 = vsel %vm2129_vm6, %v2189_v28, %v2140_v53  ;;  %v2214_v37 = vsel %vm2129_vm6, %v2213_v55, %v2164_v2 }
 0x50f   : > { %v2192_v13 = vsel %vm2129_vm6, %v2152_v63, %v2191_v23  ;;  %v2237_v50 = vrot.slane %v2224_v3, 4  ;;  %v2196_v42 = vperm.slane %v2190_v38, %v4295_v33  ;;  %v2220_v15 = vperm.slane %v2214_v37, %v4295_v33 }
 0x510   : > { %v2231_v43 = vrot.slane %v2188_v39, 4  ;;  %v2230_v26 = vsel %vm2129_vm6, %v2229_v46, %v2188_v39  ;;  %v2228_v24 = vsel %vm2129_vm6, %v2208_v34, %v2227_v11  ;;  %v2200_v5 = vperm.slane %v2192_v13, %v4295_v33 }
 0x511   : > { %2246 = vrot.lane.b32.xlu1 %v2230_v26, %s3171_s30  ;;  %2242 = vrot.lane.b32.xlu2 %v2228_v24, %s3172_s20  ;;  %v2235_v54 = vrot.slane %v2196_v42, 4  ;;  %v2233_v61 = vrot.slane %v2220_v15, 4  ;;  %v2225_v47 = vrot.slane %v2208_v34, 4 }
 0x512   : > { %v2232_v36 = vsel %vm2129_vm6, %v2212_v40, %v2231_v43  ;;  %v2238_v29 = vsel %vm2129_vm6, %v2237_v50, %v2200_v5  ;;  %v2239_v21 = vrot.slane %v2200_v5, 4 }
 0x513   : > { %2250 = vrot.lane.b32.xlu0 %v2232_v36, %s3173_s21  ;;  %v2236_v45 = vsel %vm2129_vm6, %v2220_v15, %v2235_v54  ;;  %v2234_v16 = vsel %vm2129_vm6, %v2233_v61, %v2196_v42  ;;  %v2226_v56 = vsel %vm2129_vm6, %v2225_v47, %v2184_v30 }
 0x514   : > { %v2240_v41 = vsel %vm2129_vm6, %v2224_v3, %v2239_v21 }
 0x519   : > { %2258 = vrot.lane.b32.xlu1 %v2236_v45, %s3174_s15  ;;  %2254 = vrot.lane.b32.xlu2 %v2234_v16, %s3175_s22 }
 0x51b   : > { %2262 = vrot.lane.b32.xlu0 %v2238_v29, %s3176_s18 }
 0x521   : > { %2266 = vrot.lane.b32.xlu2 %v2240_v41, %s3177_s16  ;;  %2286 = vperm.xlu1 %2844, %v2283_v12  }
 0x56b   : > { %v2243_v44 = vpop.permute.xlu2 %2242 }
 0x56c   : > { %v2270_v35 = vsel %vm2269_vm7, %v2226_v56, %v2243_v44 }
 0x573   : > { %v2255_v25 = vpop.permute.xlu2 %2254 }
 0x57b   : > { %v2267_v10 = vpop.permute.xlu2 %2266 }
 0x583   : > { %v2247_v7 = vpop.permute.xlu1 %2246 }
 0x584   : > { %v2272_v59 = vsel %vm2271_vm8, %v2270_v35, %v2247_v7 }
 0x585   : > { %v2251_v62 = vpop.permute.xlu0 %2250 }
 0x586   : > { %v2274_v63 = vsel %vm2273_vm9, %v2272_v59, %v2251_v62 }
 0x587   : > { %v2276_v14 = vsel %vm2275_vm10, %v2274_v63, %v2255_v25 }
 0x58b   : > { %v2259_v2 = vpop.permute.xlu1 %2258 }
 0x58c   : > { %v2278_v17 = vsel %vm2277_vm11, %v2276_v14, %v2259_v2 }
 0x58d   : > { %v2263_v51 = vpop.permute.xlu0 %2262 }
 0x58e   : > { %v2280_v32 = vsel %vm2279_vm12, %v2278_v17, %v2263_v51 }
 0x58f   : > { %v2282_v60 = vsel %vm2281_vm13, %v2280_v32, %v2267_v10 }
 0x590   : > { %2307 = vmatpush.msrb.mxu2 %v2282_v60 }
 0x591   : > { %2613 = vmatmul.msk.f32.vlgmr.msrb.gmra.mxu2 %vm528_vm0, %v2127_v4 }
 0x593   : > { %v2287_v8 = vpop.permute.xlu1 %2286 }
 0x614   : > { %v2309_v58 = vpop.f32.mrf.mxu2 }
 0x615   : > { %v2310_v1 = vadd.f32 %v2309_v58, %v2287_v8 }
 0x617   : > { %v2312_v6 = vmax.f32 %v2310_v1, 0.0 }
 0x619   : > { %2329 = vrot.lane.b32.xlu1 %v2312_v6, %s3171_s30  ;;  %2320 = vrot.lane.b32.xlu2 %v2312_v6, %s3174_s15 }
 0x61a   : > { %2317 = vrot.lane.b32.xlu0 %v2312_v6, %s3176_s18 }
 0x621   : > { %2323 = vrot.lane.b32.xlu1 %v2312_v6, %s3175_s22  ;;  %2314 = vrot.lane.b32.xlu2 %v2312_v6, %s3177_s16 }
 0x622   : > { %2332 = vrot.lane.b32.xlu0 %v2312_v6, %s3172_s20  ;;  %s2408_s20 = scalar_lea.hbm %s4562_s12, %s2616_s9 }
 0x623   : > { %s2411_s22 = sshll.u32 %s2408_s20, 4  ;;  %s2412_s22 = int_to_ptr.hbm [resolvable:$true] %s2411_s22 }
 0x624   : > { %s2980_s16 = sshra.s32 %s2412_s22, 4  ;;  %s2981_s16 = int_to_ptr.hbm [resolvable:$true] %s2980_s16 }
 0x625   : > { %s2982_s17 = scalar_lea.hbm %s2981_s16, 32  ;;  %p2987_p2 = scmp.lt.s32.totalorder %s2981_s16, %s4563_s1 }
 0x626   : > { %p2983_p6 = scmp.ne.s32.totalorder %s2981_s16, %s2982_s17  ;;  %p2988_p13 = scmp.lt.s32.totalorder %s2986_s3, %s2982_s17 }
 0x628   : > { %p2984_p0 = pnand %p2983_p6, %p3349_p9  ;;  %p2989_p12 = por %p2988_p13, %p2987_p2 }
 0x62a   : > { %2326 = vrot.lane.b32.xlu0 %v2312_v6, %s3173_s21  ;;  %s516_s21 = scalar_lea.vmem [#allocation10], %s3505_s5  ;;  %s2396_s5 = scalar_lea.sflag [#allocation4], %s444_s2 }
 0x62b   : > { %s2409_s15 = sshll.u32 %s516_s21, 4  ;;  %p2985_p1 = pneg %p2984_p0  ;;  %s4372_s15 = int_to_ptr.vmem [resolvable:$true] %s2409_s15 }
 0x62d   : > { %p2990_p3 = pnand %p2989_p12, %p2985_p1 }
 0x673   : > { %v2321_v0 = vpop.permute.xlu2 %2320 }
 0x674   : > { %v2341_v18 = vrot.slane %v2321_v0, 4 }
 0x67b   : > { %v2315_v49 = vpop.permute.xlu2 %2314 }
 0x67c   : > { %v2342_v53 = vsel %vm2129_vm6, %v2341_v18, %v2315_v49 }
 0x67d   : > { %v2346_v46 = vperm.slane %v2342_v53, %v4285_v27 }
 0x67f   : > { %v2359_v52 = vrot.slane %v2346_v46, 4 }
 0x68b   : > { %v2330_v31 = vpop.permute.xlu1 %2329 }
 0x68c   : > { %v2318_v48 = vpop.permute.xlu0 %2317  ;;  %v2347_v55 = vrot.slane %v2330_v31, 4 }
 0x68d   : > { %v2335_v22 = vrot.slane %v2318_v48, 4 }
 0x68f   : > { %v2336_v28 = vsel %vm2129_vm6, %v2335_v22, %v2312_v6 }
 0x690   : > { %v2340_v40 = vperm.slane %v2336_v28, %v4285_v27 }
 0x692   : > { %v2361_v30 = vrot.slane %v2340_v40, 4  ;;  %v2360_v3 = vsel %vm2129_vm6, %v2359_v52, %v2340_v40 }
 0x693   : > { %v2324_v20 = vpop.permute.xlu1 %2323  ;;  %v2366_v50 = vperm.slane %v2360_v3, %v4295_v33 }
 0x694   : > { %v2333_v19 = vpop.permute.xlu0 %2332  ;;  %v2348_v9 = vsel %vm2129_vm6, %v2347_v55, %v2324_v20  ;;  %v2362_v23 = vsel %vm2129_vm6, %v2346_v46, %v2361_v30 }
 0x695   : > { %v2352_v57 = vperm.slane %v2348_v9, %v4285_v27  ;;  %v2353_v34 = vrot.slane %v2333_v19, 4  ;;  %v2370_v11 = vperm.slane %v2362_v23, %v4295_v33  ;;  %v2385_v5 = vrot.slane %v2366_v50, 4 }
 0x697   : > { %v2373_v37 = vrot.slane %v2352_v57, 4  ;;  %v2389_v43 = vrot.slane %v2370_v11, 4 }
 0x69c   : > { %v2327_v39 = vpop.permute.xlu0 %2326 }
 0x69d   : > { %v2354_v38 = vsel %vm2129_vm6, %v2353_v34, %v2327_v39 }
 0x69e   : > { %v2358_v13 = vperm.slane %v2354_v38, %v4285_v27 }
 0x6a0   : > { %v2371_v42 = vrot.slane %v2358_v13, 4  ;;  %v2374_v15 = vsel %vm2129_vm6, %v2358_v13, %v2373_v37 }
 0x6a1   : > { %v2382_v26 = vperm.slane %v2374_v15, %v4295_v33 }
 0x6a2   : > { %v2372_v24 = vsel %vm2129_vm6, %v2371_v42, %v2352_v57 }
 0x6a3   : > { %v2378_v27 = vperm.slane %v2372_v24, %v4295_v33  ;;  %v2387_v54 = vrot.slane %v2382_v26, 4  ;;  %v2390_v61 = vsel %vm2129_vm6, %v2382_v26, %v2389_v43 }
 0x6a4   : > { %2394 = vst.msk [vmem:[%s516_s21 + $0x18] sm:$0xff] %vm2269_vm7, %v2390_v61 }
 0x6a5   : > { %v2383_v47 = vrot.slane %v2378_v27, 4  ;;  %v2386_v36 = vsel %vm2129_vm6, %v2378_v27, %v2385_v5  ;;  %v2388_v29 = vsel %vm2129_vm6, %v2387_v54, %v2370_v11 }
 0x6a6   : > { %2392 = vst.msk [vmem:[%s516_s21 + $0x8] sm:$0xff] %vm2269_vm7, %v2386_v36 }
 0x6a7   : > { %v2384_v21 = vsel %vm2129_vm6, %v2383_v47, %v2366_v50  ;;  %2393 = vst.msk [vmem:[%s516_s21 + $0x10] sm:$0xff] %vm2269_vm7, %v2388_v29 }
 0x6a8   : > { %2391 = vst.msk [vmem:[%s516_s21] sm:$0xff] %vm2269_vm7, %v2384_v21 }
 0x6a9   : > { %2993 = shalt.err (!%p2990_p3)
}
 0x6aa   : > { %s3178_s0 = smov 128   ;;  %s3179_s2 = smov 256  }
 0x6ab   : > { %s3180_s26 = smov 8  }
 0x6ac   : > { %2632 = dma.vmem_to_hbm [thread:$0]  (%p3349_p9), %s4372_s15, 512, %s2412_s22, %s2396_s5, %s3178_s0, %s3179_s2, %s3180_s26  }
 0x6ad PF: > { %s4565_s7 = sld [smem:[#allocation17_spill]]  ;;  %p2652_p4 = scmp.ge.s32.totalorder %s3152_s25, 2 }
 0x6ae   : > { %s4566_s9 = sld [smem:[#allocation28_spill]] }
 0x6b3   : > { %s2426_s8 = sand.u32 1, %s4565_s7  }
 0x6b4   : > { %p4567_p10 = scmp.ne.s32.totalorder %s4566_s9, 0  ;;  %s2427_s30 = scalar_lea.sflag [#allocation4], %s2426_s8 }
 0x6b6   : > { %p2648_p11 = pnand %p2652_p4, %p4567_p10 }
 0x6b8   : > { %p2649_p7 = pneg %p2648_p11 }
 0x6ba   : > { %3079 = dma.done.wait (%p2649_p7), %s2427_s30, 512  }
 0x6bb   : > { %3081 = vsyncadd (%p2649_p7), %s2427_s30, 4294966784  ;;  %s31_s25 = sadd.s32 1, %s3152_s25   ;;  %s4569_s15 = sld [smem:[#allocation18_spill]] }
 0x6bc   : > { %p4399_p8 = scmp.ge.s32.totalorder %s31_s25, 6   ;;  %s4570_s16 = sld [smem:[#allocation19_spill]] }
 0x6bd   : > { %s4571_s17 = sld [smem:[#allocation29_spill]]  ;;  %s4577_s30 = smov %s3092_s10 }
 0x6be   : > { %s4572_s20 = sld [smem:[#allocation20_spill]]  ;;  %s4578_s10 = smov %s3096_s11 }
 0x6bf   : > { %s4573_s21 = sld [smem:[#allocation30_spill]]  ;;  %s4580_s11 = smov %s3480_s4 }
 0x6c0   : > { %s4574_s22 = sld [smem:[#allocation23_spill]]  ;;  %s4581_s12 = smov %s3104_s13 }
 0x6c1   : > { %s4575_s23 = sld [smem:[#allocation24_spill]]  ;;  %s4582_s13 = smov %s3108_s14 }
 0x6c2   : > { %s4576_s5 = sld [smem:[#allocation25_spill]]  ;;  %s4583_s14 = smov %s3435_s27 }
 0x6c3   : > { %s4584_s18 = smov %s3128_s19 }
 0x6c4   : > { %s4585_s19 = smov %s4572_s20  ;;  %30 = sbr.rel (!%p4399_p8) target bundleno = 27 (0x1b), region = 153 }
 0x6c5   : > { %s4586_s20 = smov %s4573_s21 }
 0x6c6   : > { %s4587_s21 = smov %s4574_s22  ;;  %s4588_s22 = smov %s3148_s24 }
 0x6c8   : > { %s4589_s24 = smov %s4576_s5 }
 0x6c9   :  { %2433 = vsyncpa [#allocation3], 1 }
 0x6ca   :  { %2435 = vsyncpa [#allocation3 + $0x1], 1 }
 0x6cb   :  { %2436 = vsyncpa [#allocation6], 1 }
 0x6cc   :  { %2438 = vsyncpa [#allocation6 + $0x1], 1 }
 0x6cd   :  { %2439 = vsyncpa [#allocation9], 1 }
 0x6ce   :  { %2441 = vsyncpa [#allocation9 + $0x1], 1 }
 0x6cf   :  { %2442 = vsyncpa [#allocation4], 1 }
 0x6d0   :  { %2444 = vsyncpa [#allocation4 + $0x1], 1 }

</bundles_post_ra>
